<compile_context>
chip_gen: v5e
topology: v5e:2x2
jax: 0.10.0
libtpu: 0.0.40
codegen_flags: <defaults>
</compile_context>

<pallas_src>
import math
import numpy as np

import jax
import jax.numpy as jnp
from jax.experimental import pallas as pl

# ----------------------------- model config -----------------------------
B = 2                 # batch
F = 16                # n_features (input_size)
S = 72                # context_window
PATCH = 16            # patch_len
STRIDE = 8            # stride
P = (S - PATCH) // STRIDE + 1    # n_patches = 8
D = 32                # d_model
H = 4                 # n_heads
HD = D // H           # head dim = 8
DFF = 64              # d_ff
LAYERS = 2            # e_layers
EPS_REVIN = 1e-5
EPS_LN = 1e-5
CONF_THR = 0.45       # direction_confidence_threshold (default)

BP = B * P            # total tokens = 16
HBP = H * BP          # expanded key/value rows = 64

# head layout: [future_returns(4,tanh), direction(12), long(4), short(4), risk(4), confidence(4,tanh)]
HEAD_DIMS = [4, 12, 4, 4, 4, 4]
HEAD_HID = D // 2                  # 16
NHID = len(HEAD_DIMS) * HEAD_HID   # 96
# raw head-output columns:
#   [fr(0:4) | dir interleaved(4:16) | dir class-major dup(16:28)
#    | long(28:32) | short(32:36) | risk(36:40) | conf(40:44)]
RAW_W = 44

# -------- packed weight blob layout (rows x 128 lanes, f32) --------
W_LAYER_BASE = PATCH * F                                  # 256  (w_patch is rows [0,256))
W_LAYER_STRIDE = 4 * D                                    # 128 rows / layer
W_PROJ_BASE = W_LAYER_BASE + LAYERS * W_LAYER_STRIDE      # 512  ([proj_w | head_w1] rows)
W_HEAD2_BASE = W_PROJ_BASE + D                            # 544  (head_w2, NHID rows)
W_ROWS = W_HEAD2_BASE + NHID                              # 640

# -------- packed vector / constant blob layout (rows x 128 lanes, f32) --------
V_PE_BASE = 0                                             # (BP, D) pre-tiled PE
V_LAYER_BASE = BP                                         # 8 bias/LN rows per layer
V_LAYER_STRIDE = 8
V_FINAL_BASE = V_LAYER_BASE + LAYERS * V_LAYER_STRIDE     # 32: enc_g,enc_b,ln_g,ln_b,proj_b,head_b1,head_b2
V_HEADMASK_BASE = V_FINAL_BASE + 8                        # 40 : (HBP, D)  head block mask
V_BATCHMASK_BASE = V_HEADMASK_BASE + HBP                  # 104: (BP, HBP) same-batch mask
V_SEG_BASE = V_BATCHMASK_BASE + BP                        # 120: (HBP,HBP) segment-sum matrix
V_POOL_BASE = V_SEG_BASE + HBP                            # 184: (B, BP)   mean-pool matrix
V_ROWS = V_POOL_BASE + B                                  # 186


# ------------------------------ fused kernel ------------------------------
def fused_forward_kernel(patches_ref, w_ref, v_ref, o_out_ref, o_dir_ref, o_conf_ref):
    f32 = jnp.float32

    def layer_norm(xx, g, b):
        mu = jnp.mean(xx, axis=-1, keepdims=True)
        var = jnp.mean((xx - mu) ** 2, axis=-1, keepdims=True)
        return (xx - mu) * jax.lax.rsqrt(var + EPS_LN) * g + b

    # constant masks / pooling matrices (precomputed host-side, loaded once)
    head_mask = v_ref[V_HEADMASK_BASE:V_HEADMASK_BASE + HBP, 0:D]        # (64, 32)
    batch_mask = v_ref[V_BATCHMASK_BASE:V_BATCHMASK_BASE + BP, 0:HBP]    # (16, 64)
    seg_block = v_ref[V_SEG_BASE:V_SEG_BASE + HBP, 0:HBP]                # (64, 64)
    pool = v_ref[V_POOL_BASE:V_POOL_BASE + B, 0:BP]                      # (2, 16)

    # ---- patch embedding (Conv1d as one matmul on RevIN-normalized,
    #      pre-unfolded patches) + positional encoding (pre-tiled to B*P rows) ----
    tokens = jnp.dot(patches_ref[...], w_ref[0:PATCH * F, 0:D],
                     preferred_element_type=f32) + v_ref[0:BP, 0:D]      # (16, 32)

    inv_sqrt_hd = 1.0 / math.sqrt(HD)
    for l in range(LAYERS):
        wb = W_LAYER_BASE + l * W_LAYER_STRIDE
        vb = V_LAYER_BASE + l * V_LAYER_STRIDE
        w_qkv = w_ref[wb:wb + D, 0:3 * D]                    # (32, 96)
        w_o = w_ref[wb:wb + D, 3 * D:4 * D]                  # (32, 32)
        w1 = w_ref[wb + D:wb + 2 * D, 0:DFF]                 # (32, 64)
        w2 = w_ref[wb + 2 * D:wb + 2 * D + DFF, 0:D]         # (64, 32)
        b_qkv = v_ref[vb + 0:vb + 1, 0:3 * D]
        b_o = v_ref[vb + 1:vb + 2, 0:D]
        g1 = v_ref[vb + 2:vb + 3, 0:D]
        be1 = v_ref[vb + 3:vb + 4, 0:D]
        b1 = v_ref[vb + 4:vb + 5, 0:DFF]
        b2 = v_ref[vb + 5:vb + 6, 0:D]
        g2 = v_ref[vb + 6:vb + 7, 0:D]
        be2 = v_ref[vb + 7:vb + 8, 0:D]

        # ---- multi-head self-attention, batched over (batch, head) via a
        #      block-diagonal key/value expansion (no per-head/per-batch loops) ----
        qkv = jnp.dot(tokens, w_qkv, preferred_element_type=f32) + b_qkv   # (16, 96)
        q = qkv[:, 0:D]
        k_exp = jnp.concatenate([qkv[:, D:2 * D]] * H, axis=0) * head_mask      # (64, 32)
        v_exp = jnp.concatenate([qkv[:, 2 * D:3 * D]] * H, axis=0) * head_mask  # (64, 32)
        # scores for every (query token, head, key token) pair in one NT matmul
        s = jax.lax.dot_general(q, k_exp, (((1,), (1,)), ((), ())),
                                preferred_element_type=f32) * inv_sqrt_hd  # (16, 64)
        s = s - jnp.max(s, axis=-1, keepdims=True)           # per-row shift (softmax-invariant)
        e = jnp.exp(s) * batch_mask                          # zero cross-batch entries
        denom = jnp.dot(e, seg_block, preferred_element_type=f32)          # per-(head,batch) sums
        a = e / (denom + (1.0 - batch_mask))                 # exact softmax; guard zero segments
        attn = jnp.dot(a, v_exp, preferred_element_type=f32)               # (16, 32) heads concat'd
        attn = jnp.dot(attn, w_o, preferred_element_type=f32) + b_o

        xx = layer_norm(tokens + attn, g1, be1)
        # TODO(synk): torch nn.GELU default is exact erf; tanh approximation used here.
        h1 = jax.nn.gelu(jnp.dot(xx, w1, preferred_element_type=f32) + b1)
        ff = jnp.dot(h1, w2, preferred_element_type=f32) + b2
        tokens = layer_norm(xx + ff, g2, be2)

    # ---- final encoder LayerNorm + mean-pool over patches (one tiny matmul) ----
    fb = V_FINAL_BASE
    enc = layer_norm(tokens, v_ref[fb + 0:fb + 1, 0:D], v_ref[fb + 1:fb + 2, 0:D])
    xg = jnp.dot(pool, enc, preferred_element_type=f32)                     # (B, 32)
    xg = layer_norm(xg, v_ref[fb + 2:fb + 3, 0:D], v_ref[fb + 3:fb + 4, 0:D])
    xp = jnp.dot(xg, w_ref[W_PROJ_BASE:W_PROJ_BASE + D, 0:D],
                 preferred_element_type=f32) + v_ref[fb + 4:fb + 5, 0:D]    # output_projection

    # ---- all six heads fused: stacked W1 + block W2 (two matmuls) ----
    hid = jnp.maximum(
        jnp.dot(xp, w_ref[W_PROJ_BASE:W_PROJ_BASE + D, D:D + NHID],
                preferred_element_type=f32) + v_ref[fb + 5:fb + 6, 0:NHID], 0.0)   # (B, 96)
    raw = jnp.dot(hid, w_ref[W_HEAD2_BASE:W_HEAD2_BASE + NHID, 0:RAW_W],
                  preferred_element_type=f32) + v_ref[fb + 6:fb + 7, 0:RAW_W]       # (B, 44)

    fr = jnp.tanh(raw[:, 0:4])                      # future_returns
    dir_il = raw[:, 4:16]                           # direction logits, (g, c)-interleaved
    l0 = raw[:, 16:20]                              # class-major duplicates for grouped softmax
    l1 = raw[:, 20:24]
    l2 = raw[:, 24:28]
    long_l = raw[:, 28:32]
    short_l = raw[:, 32:36]
    risk = raw[:, 36:40]
    conf = jnp.tanh(raw[:, 40:44])                  # confidence

    # direction softmax (over 3 classes per horizon), argmax and confidence gate
    m = jnp.maximum(jnp.maximum(l0, l1), l2)
    e0 = jnp.exp(l0 - m)
    e1 = jnp.exp(l1 - m)
    e2 = jnp.exp(l2 - m)
    denom3 = e0 + e1 + e2
    max_prob = jnp.maximum(jnp.maximum(e0, e1), e2) / denom3
    dir_idx = jnp.where((e0 >= e1) & (e0 >= e2), 0.0,
                        jnp.where(e1 >= e2, 1.0, 2.0))
    directions = jnp.where(max_prob < CONF_THR, 2.0, dir_idx)

    outputs = jnp.clip(
        jnp.concatenate([fr, directions, long_l, short_l, risk], axis=1),
        -10.0, 10.0)                                                        # (B, 20)

    o_out_ref[...] = outputs
    o_dir_ref[...] = dir_il
    o_conf_ref[...] = conf


def fused_forward(patches_flat, wblob, vblob):
    # Gridless single-program call: optimal on single-TC v5e/v6e; a batch-parallel
    # grid over v7x's two TensorCores only pays off for batches larger than 2.
    return pl.pallas_call(
        fused_forward_kernel,
        out_shape=(jax.ShapeDtypeStruct((B, 20), jnp.float32),
                   jax.ShapeDtypeStruct((B, 12), jnp.float32),
                   jax.ShapeDtypeStruct((B, 4), jnp.float32)),
        cost_estimate=pl.CostEstimate(flops=1_800_000, transcendentals=4_500,
                                      bytes_accessed=370_000),
    )(patches_flat, wblob, vblob)


# ------------------------------ parameters -------------------------------
def sinusoidal_pe(n_pos, d):
    pe = np.zeros((n_pos, d), dtype=np.float32)
    pos = np.arange(n_pos, dtype=np.float32)[:, None]
    div = np.exp(np.arange(0, d, 2, dtype=np.float32) * (-math.log(10000.0) / d))
    pe[:, 0::2] = np.sin(pos * div)
    pe[:, 1::2] = np.cos(pos * div)
    return pe


def init_params(key):
    keys = iter(jax.random.split(key, 64))

    def nxt():
        return next(keys)

    def xavier(shape, gain=0.5):
        fan_in, fan_out = shape
        a = gain * math.sqrt(6.0 / (fan_in + fan_out))
        return jax.random.uniform(nxt(), shape, jnp.float32, minval=-a, maxval=a)

    p = {}
    # RevIN affine (torch init: ones / zeros)
    p['revin_w'] = jnp.ones((F,), jnp.float32)
    p['revin_b'] = jnp.zeros((F,), jnp.float32)

    # Conv1d patch embedding: kaiming-normal * 0.7, flattened so that
    # Wflat[k*F + c, d] == Wconv[d, c, k]
    conv = jax.random.normal(nxt(), (D, F, PATCH), jnp.float32) * (
        math.sqrt(2.0 / (F * PATCH)) * 0.7)
    p['w_patch'] = jnp.transpose(conv, (2, 1, 0)).reshape(PATCH * F, D)

    layers = []
    for _ in range(LAYERS):
        layers.append(dict(
            wq=xavier((D, D)), wk=xavier((D, D)), wv=xavier((D, D)), wo=xavier((D, D)),
            bq=jnp.zeros((D,), jnp.float32), bk=jnp.zeros((D,), jnp.float32),
            bv=jnp.zeros((D,), jnp.float32), bo=jnp.zeros((D,), jnp.float32),
            g1=jnp.ones((D,), jnp.float32), be1=jnp.zeros((D,), jnp.float32),
            w1=xavier((D, DFF)), b1=jnp.zeros((DFF,), jnp.float32),
            w2=xavier((DFF, D)), b2=jnp.zeros((D,), jnp.float32),
            g2=jnp.ones((D,), jnp.float32), be2=jnp.zeros((D,), jnp.float32),
        ))
    p['layers'] = layers

    p['enc_norm_g'] = jnp.ones((D,), jnp.float32)
    p['enc_norm_b'] = jnp.zeros((D,), jnp.float32)
    p['ln_g'] = jnp.ones((D,), jnp.float32)
    p['ln_b'] = jnp.zeros((D,), jnp.float32)
    p['proj_w'] = xavier((D, D))
    p['proj_b'] = jnp.zeros((D,), jnp.float32)

    heads = []
    for i, width in enumerate(HEAD_DIMS):
        w1 = xavier((D, HEAD_HID), gain=0.8 if i == 1 else 0.5)
        b1 = jnp.zeros((HEAD_HID,), jnp.float32)
        w2 = xavier((HEAD_HID, width), gain=0.1 if i == 1 else 0.5)
        if i == 1:  # direction head: 'balanced' bias init -> (4,3) rows [0.5, 0.5, -0.5]
            b2 = jnp.tile(jnp.array([0.5, 0.5, -0.5], jnp.float32), 4)
        else:
            b2 = jnp.zeros((width,), jnp.float32)
        heads.append((w1, b1, w2, b2))
    p['heads'] = heads
    return p


def pack_params(p):
    """Pack every weight / bias / constant into two lane-padded blobs."""
    # ----- weight blob -----
    wblob = np.zeros((W_ROWS, 128), np.float32)
    wblob[0:PATCH * F, 0:D] = np.asarray(p['w_patch'])
    for l, L in enumerate(p['layers']):
        wb = W_LAYER_BASE + l * W_LAYER_STRIDE
        wblob[wb:wb + D, 0:D] = np.asarray(L['wq'])
        wblob[wb:wb + D, D:2 * D] = np.asarray(L['wk'])
        wblob[wb:wb + D, 2 * D:3 * D] = np.asarray(L['wv'])
        wblob[wb:wb + D, 3 * D:4 * D] = np.asarray(L['wo'])
        wblob[wb + D:wb + 2 * D, 0:DFF] = np.asarray(L['w1'])
        wblob[wb + 2 * D:wb + 2 * D + DFF, 0:D] = np.asarray(L['w2'])
    wblob[W_PROJ_BASE:W_PROJ_BASE + D, 0:D] = np.asarray(p['proj_w'])

    # raw-output column start per head (direction interleaved block at 4:16,
    # its class-major duplicate at 16:28)
    col_starts = [0, 4, 28, 32, 36, 40]
    for i, (w1, b1, w2, b2) in enumerate(p['heads']):
        wblob[W_PROJ_BASE:W_PROJ_BASE + D,
              D + i * HEAD_HID:D + (i + 1) * HEAD_HID] = np.asarray(w1)
        rows = slice(W_HEAD2_BASE + i * HEAD_HID, W_HEAD2_BASE + (i + 1) * HEAD_HID)
        w2n = np.asarray(w2)
        wblob[rows, col_starts[i]:col_starts[i] + HEAD_DIMS[i]] = w2n
        if i == 1:
            for c in range(3):
                for g in range(4):
                    wblob[rows, 16 + c * 4 + g] = w2n[:, g * 3 + c]

    # ----- vector / constant blob -----
    vblob = np.zeros((V_ROWS, 128), np.float32)
    vblob[0:BP, 0:D] = np.tile(sinusoidal_pe(P, D), (B, 1))
    for l, L in enumerate(p['layers']):
        vb = V_LAYER_BASE + l * V_LAYER_STRIDE
        vblob[vb + 0, 0:3 * D] = np.concatenate(
            [np.asarray(L['bq']), np.asarray(L['bk']), np.asarray(L['bv'])])
        vblob[vb + 1, 0:D] = np.asarray(L['bo'])
        vblob[vb + 2, 0:D] = np.asarray(L['g1'])
        vblob[vb + 3, 0:D] = np.asarray(L['be1'])
        vblob[vb + 4, 0:DFF] = np.asarray(L['b1'])
        vblob[vb + 5, 0:D] = np.asarray(L['b2'])
        vblob[vb + 6, 0:D] = np.asarray(L['g2'])
        vblob[vb + 7, 0:D] = np.asarray(L['be2'])
    fb = V_FINAL_BASE
    vblob[fb + 0, 0:D] = np.asarray(p['enc_norm_g'])
    vblob[fb + 1, 0:D] = np.asarray(p['enc_norm_b'])
    vblob[fb + 2, 0:D] = np.asarray(p['ln_g'])
    vblob[fb + 3, 0:D] = np.asarray(p['ln_b'])
    vblob[fb + 4, 0:D] = np.asarray(p['proj_b'])
    vblob[fb + 5, 0:NHID] = np.concatenate([np.asarray(b1) for (_, b1, _, _) in p['heads']])
    b2_packed = np.zeros((RAW_W,), np.float32)
    for i, (_, _, _, b2) in enumerate(p['heads']):
        b2n = np.asarray(b2)
        b2_packed[col_starts[i]:col_starts[i] + HEAD_DIMS[i]] = b2n
        if i == 1:
            for c in range(3):
                for g in range(4):
                    b2_packed[16 + c * 4 + g] = b2n[g * 3 + c]
    vblob[fb + 6, 0:RAW_W] = b2_packed

    # ----- attention / pooling constant matrices (no in-kernel iota work) -----
    r = np.arange(HBP)[:, None]
    c = np.arange(D)[None, :]
    vblob[V_HEADMASK_BASE:V_HEADMASK_BASE + HBP, 0:D] = \
        (r // BP == c // HD).astype(np.float32)                     # head block mask
    i_q = np.arange(BP)[:, None]
    r_k = np.arange(HBP)[None, :]
    vblob[V_BATCHMASK_BASE:V_BATCHMASK_BASE + BP, 0:HBP] = \
        ((i_q // P) == ((r_k // P) % B)).astype(np.float32)         # same-batch mask
    r1 = np.arange(HBP)[:, None]
    r2 = np.arange(HBP)[None, :]
    vblob[V_SEG_BASE:V_SEG_BASE + HBP, 0:HBP] = \
        (r1 // P == r2 // P).astype(np.float32)                     # segment-sum matrix
    bb = np.arange(B)[:, None]
    ii = np.arange(BP)[None, :]
    vblob[V_POOL_BASE:V_POOL_BASE + B, 0:BP] = \
        (bb == ii // P).astype(np.float32) / P                      # mean-pool matrix

    return dict(wblob=jnp.asarray(wblob), vblob=jnp.asarray(vblob),
                revin_w=jnp.asarray(p['revin_w']), revin_b=jnp.asarray(p['revin_b']))


# -------------------------------- forward --------------------------------
def forward(packed, x):
    # RevIN 'norm' (unbiased variance = torch.var default) computed in the wrapper
    # so it fuses with the patch-unfold gather (no extra dispatch, no in-kernel
    # cross-sublane statistics).
    mean = jnp.mean(x, axis=1, keepdims=True)
    var = jnp.var(x, axis=1, keepdims=True, ddof=1)
    x_norm = (x - mean) / jnp.sqrt(var + EPS_REVIN)
    x_norm = x_norm * packed['revin_w'] + packed['revin_b']

    # patch unfold: patches_flat[b*P + p, k*F + c] == x_norm[b, p*STRIDE + k, c]
    idx = (jnp.arange(P) * STRIDE)[:, None] + jnp.arange(PATCH)[None, :]
    patches_flat = x_norm[:, idx, :].reshape(B * P, PATCH * F)

    outputs, dir12, conf = fused_forward(patches_flat, packed['wblob'], packed['vblob'])
    direction_logits = dir12.reshape(B, 4, 3)   # same (g, c) order as torch .view(B, 4, 3)
    return outputs, direction_logits, conf


# ---------------------------------- main ----------------------------------
if __name__ == "__main__":
    root = jax.random.PRNGKey(0)
    k_x, k_p = jax.random.split(root)
    x = jax.random.normal(k_x, (B, S, F), jnp.float32)
    params = init_params(k_p)
    packed = pack_params(params)

    fwd = jax.jit(forward)
    outputs, dir_logits, conf = fwd(packed, x)
    outputs = jax.block_until_ready(outputs)
    jax.block_until_ready(dir_logits)
    jax.block_until_ready(conf)

    assert outputs.shape == (B, 20), outputs.shape
    assert dir_logits.shape == (B, 4, 3)
    assert conf.shape == (B, 4)
    assert bool(jnp.all(jnp.isfinite(outputs)))
    assert bool(jnp.all(jnp.isfinite(dir_logits)))
    assert bool(jnp.all(jnp.isfinite(conf)))
    print("KERNEL_OK")
</pallas_src>

<mosaic_0001>
module attributes {stable_mosaic.version = 11 : i64} {
  func.func @fused_forward_kernel(%arg0: memref<16x256xf32, #tpu.memory_space<vmem>>, %arg1: memref<640x128xf32, #tpu.memory_space<vmem>>, %arg2: memref<186x128xf32, #tpu.memory_space<vmem>>, %arg3: memref<2x20xf32, #tpu.memory_space<vmem>>, %arg4: memref<2x12xf32, #tpu.memory_space<vmem>>, %arg5: memref<2x4xf32, #tpu.memory_space<vmem>>) attributes {dimension_semantics = [], scalar_prefetch = 0 : i64, scratch_operands = 0 : i64, tpu.core_type = #tpu.core_type<tc>} {
    %c40 = arith.constant 40 : index
    %c0 = arith.constant 0 : index
    %0 = vector.load %arg2[%c40, %c0] : memref<186x128xf32, #tpu.memory_space<vmem>>, vector<64x32xf32>
    %c104 = arith.constant 104 : index
    %c0_0 = arith.constant 0 : index
    %1 = vector.load %arg2[%c104, %c0_0] : memref<186x128xf32, #tpu.memory_space<vmem>>, vector<16x64xf32>
    %c120 = arith.constant 120 : index
    %c0_1 = arith.constant 0 : index
    %2 = vector.load %arg2[%c120, %c0_1] : memref<186x128xf32, #tpu.memory_space<vmem>>, vector<64x64xf32>
    %c184 = arith.constant 184 : index
    %c0_2 = arith.constant 0 : index
    %3 = vector.load %arg2[%c184, %c0_2] : memref<186x128xf32, #tpu.memory_space<vmem>>, vector<2x16xf32>
    %c0_3 = arith.constant 0 : index
    %c0_4 = arith.constant 0 : index
    %4 = vector.load %arg0[%c0_3, %c0_4] : memref<16x256xf32, #tpu.memory_space<vmem>>, vector<16x256xf32>
    %c0_5 = arith.constant 0 : index
    %c0_6 = arith.constant 0 : index
    %5 = vector.load %arg1[%c0_5, %c0_6] : memref<640x128xf32, #tpu.memory_space<vmem>>, vector<256x32xf32>
    %cst = arith.constant dense<0.000000e+00> : vector<16x32xf32>
    %6 = tpu.matmul %4, %5, %cst {dimension_numbers = #tpu.dot_dimension_numbers<[1], [0], [0], [1], [0, 0, 1, 1], [], []>} : vector<16x256xf32>, vector<256x32xf32>, vector<16x32xf32> -> vector<16x32xf32>
    %c0_7 = arith.constant 0 : index
    %c0_8 = arith.constant 0 : index
    %7 = vector.load %arg2[%c0_7, %c0_8] : memref<186x128xf32, #tpu.memory_space<vmem>>, vector<16x32xf32>
    %8 = arith.addf %6, %7 : vector<16x32xf32>
    %c256 = arith.constant 256 : index
    %c0_9 = arith.constant 0 : index
    %9 = vector.load %arg1[%c256, %c0_9] : memref<640x128xf32, #tpu.memory_space<vmem>>, vector<32x96xf32>
    %c256_10 = arith.constant 256 : index
    %c96 = arith.constant 96 : index
    %10 = vector.load %arg1[%c256_10, %c96] : memref<640x128xf32, #tpu.memory_space<vmem>>, vector<32x32xf32>
    %c288 = arith.constant 288 : index
    %c0_11 = arith.constant 0 : index
    %11 = vector.load %arg1[%c288, %c0_11] : memref<640x128xf32, #tpu.memory_space<vmem>>, vector<32x64xf32>
    %c320 = arith.constant 320 : index
    %c0_12 = arith.constant 0 : index
    %12 = vector.load %arg1[%c320, %c0_12] : memref<640x128xf32, #tpu.memory_space<vmem>>, vector<64x32xf32>
    %c16 = arith.constant 16 : index
    %c0_13 = arith.constant 0 : index
    %13 = vector.load %arg2[%c16, %c0_13] : memref<186x128xf32, #tpu.memory_space<vmem>>, vector<1x96xf32>
    %c17 = arith.constant 17 : index
    %c0_14 = arith.constant 0 : index
    %14 = vector.load %arg2[%c17, %c0_14] : memref<186x128xf32, #tpu.memory_space<vmem>>, vector<1x32xf32>
    %c18 = arith.constant 18 : index
    %c0_15 = arith.constant 0 : index
    %15 = vector.load %arg2[%c18, %c0_15] : memref<186x128xf32, #tpu.memory_space<vmem>>, vector<1x32xf32>
    %c19 = arith.constant 19 : index
    %c0_16 = arith.constant 0 : index
    %16 = vector.load %arg2[%c19, %c0_16] : memref<186x128xf32, #tpu.memory_space<vmem>>, vector<1x32xf32>
    %c20 = arith.constant 20 : index
    %c0_17 = arith.constant 0 : index
    %17 = vector.load %arg2[%c20, %c0_17] : memref<186x128xf32, #tpu.memory_space<vmem>>, vector<1x64xf32>
    %c21 = arith.constant 21 : index
    %c0_18 = arith.constant 0 : index
    %18 = vector.load %arg2[%c21, %c0_18] : memref<186x128xf32, #tpu.memory_space<vmem>>, vector<1x32xf32>
    %c22 = arith.constant 22 : index
    %c0_19 = arith.constant 0 : index
    %19 = vector.load %arg2[%c22, %c0_19] : memref<186x128xf32, #tpu.memory_space<vmem>>, vector<1x32xf32>
    %c23 = arith.constant 23 : index
    %c0_20 = arith.constant 0 : index
    %20 = vector.load %arg2[%c23, %c0_20] : memref<186x128xf32, #tpu.memory_space<vmem>>, vector<1x32xf32>
    %cst_21 = arith.constant dense<0.000000e+00> : vector<16x96xf32>
    %21 = tpu.matmul %8, %9, %cst_21 {dimension_numbers = #tpu.dot_dimension_numbers<[1], [0], [0], [1], [0, 0, 1, 1], [], []>} : vector<16x32xf32>, vector<32x96xf32>, vector<16x96xf32> -> vector<16x96xf32>
    %22 = vector.broadcast %13 : vector<1x96xf32> to vector<16x96xf32>
    %23 = arith.addf %21, %22 : vector<16x96xf32>
    %24 = vector.extract_strided_slice %23 {offsets = [0, 0], sizes = [16, 32], strides = [1, 1]} : vector<16x96xf32> to vector<16x32xf32>
    %25 = vector.extract_strided_slice %23 {offsets = [0, 32], sizes = [16, 32], strides = [1, 1]} : vector<16x96xf32> to vector<16x32xf32>
    %26 = tpu.concatenate %25, %25, %25, %25 in 0 : vector<16x32xf32>, vector<16x32xf32>, vector<16x32xf32>, vector<16x32xf32> -> vector<64x32xf32>
    %27 = arith.mulf %26, %0 : vector<64x32xf32>
    %28 = vector.extract_strided_slice %23 {offsets = [0, 64], sizes = [16, 32], strides = [1, 1]} : vector<16x96xf32> to vector<16x32xf32>
    %29 = tpu.concatenate %28, %28, %28, %28 in 0 : vector<16x32xf32>, vector<16x32xf32>, vector<16x32xf32>, vector<16x32xf32> -> vector<64x32xf32>
    %30 = arith.mulf %29, %0 : vector<64x32xf32>
    %cst_22 = arith.constant dense<0.000000e+00> : vector<16x64xf32>
    %31 = tpu.matmul %24, %27, %cst_22 {dimension_numbers = #tpu.dot_dimension_numbers<[1], [1], [0], [0], [0, 0, 1, 0], [], []>} : vector<16x32xf32>, vector<64x32xf32>, vector<16x64xf32> -> vector<16x64xf32>
    %cst_23 = arith.constant 0.353553385 : f32
    %32 = vector.broadcast %cst_23 : f32 to vector<16x64xf32>
    %33 = arith.mulf %31, %32 : vector<16x64xf32>
    %cst_24 = arith.constant dense<0xFF800000> : vector<16xf32>
    %34 = vector.multi_reduction <maximumf>, %33, %cst_24 [1] : vector<16x64xf32> to vector<16xf32>
    %35 = vector.shape_cast %34 : vector<16xf32> to vector<16x1xf32>
    %36 = vector.broadcast %35 : vector<16x1xf32> to vector<16x64xf32>
    %37 = arith.subf %33, %36 : vector<16x64xf32>
    %38 = math.exp %37 : vector<16x64xf32>
    %39 = arith.mulf %38, %1 : vector<16x64xf32>
    %cst_25 = arith.constant dense<0.000000e+00> : vector<16x64xf32>
    %40 = tpu.matmul %39, %2, %cst_25 {dimension_numbers = #tpu.dot_dimension_numbers<[1], [0], [0], [1], [0, 0, 1, 1], [], []>} : vector<16x64xf32>, vector<64x64xf32>, vector<16x64xf32> -> vector<16x64xf32>
    %cst_26 = arith.constant 1.000000e+00 : f32
    %41 = vector.broadcast %cst_26 : f32 to vector<16x64xf32>
    %42 = arith.subf %41, %1 : vector<16x64xf32>
    %43 = arith.addf %40, %42 : vector<16x64xf32>
    %44 = arith.divf %39, %43 : vector<16x64xf32>
    %cst_27 = arith.constant dense<0.000000e+00> : vector<16x32xf32>
    %45 = tpu.matmul %44, %30, %cst_27 {dimension_numbers = #tpu.dot_dimension_numbers<[1], [0], [0], [1], [0, 0, 1, 1], [], []>} : vector<16x64xf32>, vector<64x32xf32>, vector<16x32xf32> -> vector<16x32xf32>
    %cst_28 = arith.constant dense<0.000000e+00> : vector<16x32xf32>
    %46 = tpu.matmul %45, %10, %cst_28 {dimension_numbers = #tpu.dot_dimension_numbers<[1], [0], [0], [1], [0, 0, 1, 1], [], []>} : vector<16x32xf32>, vector<32x32xf32>, vector<16x32xf32> -> vector<16x32xf32>
    %47 = vector.broadcast %14 : vector<1x32xf32> to vector<16x32xf32>
    %48 = arith.addf %46, %47 : vector<16x32xf32>
    %49 = arith.addf %8, %48 : vector<16x32xf32>
    %cst_29 = arith.constant dense<0.000000e+00> : vector<16xf32>
    %50 = vector.multi_reduction <add>, %49, %cst_29 [1] : vector<16x32xf32> to vector<16xf32>
    %51 = vector.shape_cast %50 : vector<16xf32> to vector<16x1xf32>
    %cst_30 = arith.constant 3.200000e+01 : f32
    %52 = vector.broadcast %cst_30 : f32 to vector<16x1xf32>
    %53 = arith.divf %51, %52 : vector<16x1xf32>
    %54 = vector.broadcast %53 : vector<16x1xf32> to vector<16x32xf32>
    %55 = arith.subf %49, %54 : vector<16x32xf32>
    %56 = arith.mulf %55, %55 : vector<16x32xf32>
    %cst_31 = arith.constant dense<0.000000e+00> : vector<16xf32>
    %57 = vector.multi_reduction <add>, %56, %cst_31 [1] : vector<16x32xf32> to vector<16xf32>
    %58 = vector.shape_cast %57 : vector<16xf32> to vector<16x1xf32>
    %cst_32 = arith.constant 3.200000e+01 : f32
    %59 = vector.broadcast %cst_32 : f32 to vector<16x1xf32>
    %60 = arith.divf %58, %59 : vector<16x1xf32>
    %61 = vector.broadcast %53 : vector<16x1xf32> to vector<16x32xf32>
    %62 = arith.subf %49, %61 : vector<16x32xf32>
    %cst_33 = arith.constant 9.99999974E-6 : f32
    %63 = vector.broadcast %cst_33 : f32 to vector<16x1xf32>
    %64 = arith.addf %60, %63 : vector<16x1xf32>
    %65 = math.rsqrt %64 : vector<16x1xf32>
    %66 = vector.broadcast %65 : vector<16x1xf32> to vector<16x32xf32>
    %67 = arith.mulf %62, %66 : vector<16x32xf32>
    %68 = vector.broadcast %15 : vector<1x32xf32> to vector<16x32xf32>
    %69 = arith.mulf %67, %68 : vector<16x32xf32>
    %70 = vector.broadcast %16 : vector<1x32xf32> to vector<16x32xf32>
    %71 = arith.addf %69, %70 : vector<16x32xf32>
    %cst_34 = arith.constant dense<0.000000e+00> : vector<16x64xf32>
    %72 = tpu.matmul %71, %11, %cst_34 {dimension_numbers = #tpu.dot_dimension_numbers<[1], [0], [0], [1], [0, 0, 1, 1], [], []>} : vector<16x32xf32>, vector<32x64xf32>, vector<16x64xf32> -> vector<16x64xf32>
    %73 = vector.broadcast %17 : vector<1x64xf32> to vector<16x64xf32>
    %74 = arith.addf %72, %73 : vector<16x64xf32>
    %75 = arith.mulf %74, %74 : vector<16x64xf32>
    %76 = arith.mulf %74, %75 : vector<16x64xf32>
    %cst_35 = arith.constant 4.471500e-02 : f32
    %77 = vector.broadcast %cst_35 : f32 to vector<16x64xf32>
    %78 = arith.mulf %77, %76 : vector<16x64xf32>
    %79 = arith.addf %74, %78 : vector<16x64xf32>
    %cst_36 = arith.constant 0.797884583 : f32
    %80 = vector.broadcast %cst_36 : f32 to vector<16x64xf32>
    %81 = arith.mulf %80, %79 : vector<16x64xf32>
    %82 = math.tanh %81 : vector<16x64xf32>
    %cst_37 = arith.constant 1.000000e+00 : f32
    %83 = vector.broadcast %cst_37 : f32 to vector<16x64xf32>
    %84 = arith.addf %83, %82 : vector<16x64xf32>
    %cst_38 = arith.constant 5.000000e-01 : f32
    %85 = vector.broadcast %cst_38 : f32 to vector<16x64xf32>
    %86 = arith.mulf %85, %84 : vector<16x64xf32>
    %87 = arith.mulf %74, %86 : vector<16x64xf32>
    %cst_39 = arith.constant dense<0.000000e+00> : vector<16x32xf32>
    %88 = tpu.matmul %87, %12, %cst_39 {dimension_numbers = #tpu.dot_dimension_numbers<[1], [0], [0], [1], [0, 0, 1, 1], [], []>} : vector<16x64xf32>, vector<64x32xf32>, vector<16x32xf32> -> vector<16x32xf32>
    %89 = vector.broadcast %18 : vector<1x32xf32> to vector<16x32xf32>
    %90 = arith.addf %88, %89 : vector<16x32xf32>
    %91 = arith.addf %71, %90 : vector<16x32xf32>
    %cst_40 = arith.constant dense<0.000000e+00> : vector<16xf32>
    %92 = vector.multi_reduction <add>, %91, %cst_40 [1] : vector<16x32xf32> to vector<16xf32>
    %93 = vector.shape_cast %92 : vector<16xf32> to vector<16x1xf32>
    %cst_41 = arith.constant 3.200000e+01 : f32
    %94 = vector.broadcast %cst_41 : f32 to vector<16x1xf32>
    %95 = arith.divf %93, %94 : vector<16x1xf32>
    %96 = vector.broadcast %95 : vector<16x1xf32> to vector<16x32xf32>
    %97 = arith.subf %91, %96 : vector<16x32xf32>
    %98 = arith.mulf %97, %97 : vector<16x32xf32>
    %cst_42 = arith.constant dense<0.000000e+00> : vector<16xf32>
    %99 = vector.multi_reduction <add>, %98, %cst_42 [1] : vector<16x32xf32> to vector<16xf32>
    %100 = vector.shape_cast %99 : vector<16xf32> to vector<16x1xf32>
    %cst_43 = arith.constant 3.200000e+01 : f32
    %101 = vector.broadcast %cst_43 : f32 to vector<16x1xf32>
    %102 = arith.divf %100, %101 : vector<16x1xf32>
    %103 = vector.broadcast %95 : vector<16x1xf32> to vector<16x32xf32>
    %104 = arith.subf %91, %103 : vector<16x32xf32>
    %cst_44 = arith.constant 9.99999974E-6 : f32
    %105 = vector.broadcast %cst_44 : f32 to vector<16x1xf32>
    %106 = arith.addf %102, %105 : vector<16x1xf32>
    %107 = math.rsqrt %106 : vector<16x1xf32>
    %108 = vector.broadcast %107 : vector<16x1xf32> to vector<16x32xf32>
    %109 = arith.mulf %104, %108 : vector<16x32xf32>
    %110 = vector.broadcast %19 : vector<1x32xf32> to vector<16x32xf32>
    %111 = arith.mulf %109, %110 : vector<16x32xf32>
    %112 = vector.broadcast %20 : vector<1x32xf32> to vector<16x32xf32>
    %113 = arith.addf %111, %112 : vector<16x32xf32>
    %c384 = arith.constant 384 : index
    %c0_45 = arith.constant 0 : index
    %114 = vector.load %arg1[%c384, %c0_45] : memref<640x128xf32, #tpu.memory_space<vmem>>, vector<32x96xf32>
    %c384_46 = arith.constant 384 : index
    %c96_47 = arith.constant 96 : index
    %115 = vector.load %arg1[%c384_46, %c96_47] : memref<640x128xf32, #tpu.memory_space<vmem>>, vector<32x32xf32>
    %c416 = arith.constant 416 : index
    %c0_48 = arith.constant 0 : index
    %116 = vector.load %arg1[%c416, %c0_48] : memref<640x128xf32, #tpu.memory_space<vmem>>, vector<32x64xf32>
    %c448 = arith.constant 448 : index
    %c0_49 = arith.constant 0 : index
    %117 = vector.load %arg1[%c448, %c0_49] : memref<640x128xf32, #tpu.memory_space<vmem>>, vector<64x32xf32>
    %c24 = arith.constant 24 : index
    %c0_50 = arith.constant 0 : index
    %118 = vector.load %arg2[%c24, %c0_50] : memref<186x128xf32, #tpu.memory_space<vmem>>, vector<1x96xf32>
    %c25 = arith.constant 25 : index
    %c0_51 = arith.constant 0 : index
    %119 = vector.load %arg2[%c25, %c0_51] : memref<186x128xf32, #tpu.memory_space<vmem>>, vector<1x32xf32>
    %c26 = arith.constant 26 : index
    %c0_52 = arith.constant 0 : index
    %120 = vector.load %arg2[%c26, %c0_52] : memref<186x128xf32, #tpu.memory_space<vmem>>, vector<1x32xf32>
    %c27 = arith.constant 27 : index
    %c0_53 = arith.constant 0 : index
    %121 = vector.load %arg2[%c27, %c0_53] : memref<186x128xf32, #tpu.memory_space<vmem>>, vector<1x32xf32>
    %c28 = arith.constant 28 : index
    %c0_54 = arith.constant 0 : index
    %122 = vector.load %arg2[%c28, %c0_54] : memref<186x128xf32, #tpu.memory_space<vmem>>, vector<1x64xf32>
    %c29 = arith.constant 29 : index
    %c0_55 = arith.constant 0 : index
    %123 = vector.load %arg2[%c29, %c0_55] : memref<186x128xf32, #tpu.memory_space<vmem>>, vector<1x32xf32>
    %c30 = arith.constant 30 : index
    %c0_56 = arith.constant 0 : index
    %124 = vector.load %arg2[%c30, %c0_56] : memref<186x128xf32, #tpu.memory_space<vmem>>, vector<1x32xf32>
    %c31 = arith.constant 31 : index
    %c0_57 = arith.constant 0 : index
    %125 = vector.load %arg2[%c31, %c0_57] : memref<186x128xf32, #tpu.memory_space<vmem>>, vector<1x32xf32>
    %cst_58 = arith.constant dense<0.000000e+00> : vector<16x96xf32>
    %126 = tpu.matmul %113, %114, %cst_58 {dimension_numbers = #tpu.dot_dimension_numbers<[1], [0], [0], [1], [0, 0, 1, 1], [], []>} : vector<16x32xf32>, vector<32x96xf32>, vector<16x96xf32> -> vector<16x96xf32>
    %127 = vector.broadcast %118 : vector<1x96xf32> to vector<16x96xf32>
    %128 = arith.addf %126, %127 : vector<16x96xf32>
    %129 = vector.extract_strided_slice %128 {offsets = [0, 0], sizes = [16, 32], strides = [1, 1]} : vector<16x96xf32> to vector<16x32xf32>
    %130 = vector.extract_strided_slice %128 {offsets = [0, 32], sizes = [16, 32], strides = [1, 1]} : vector<16x96xf32> to vector<16x32xf32>
    %131 = tpu.concatenate %130, %130, %130, %130 in 0 : vector<16x32xf32>, vector<16x32xf32>, vector<16x32xf32>, vector<16x32xf32> -> vector<64x32xf32>
    %132 = arith.mulf %131, %0 : vector<64x32xf32>
    %133 = vector.extract_strided_slice %128 {offsets = [0, 64], sizes = [16, 32], strides = [1, 1]} : vector<16x96xf32> to vector<16x32xf32>
    %134 = tpu.concatenate %133, %133, %133, %133 in 0 : vector<16x32xf32>, vector<16x32xf32>, vector<16x32xf32>, vector<16x32xf32> -> vector<64x32xf32>
    %135 = arith.mulf %134, %0 : vector<64x32xf32>
    %cst_59 = arith.constant dense<0.000000e+00> : vector<16x64xf32>
    %136 = tpu.matmul %129, %132, %cst_59 {dimension_numbers = #tpu.dot_dimension_numbers<[1], [1], [0], [0], [0, 0, 1, 0], [], []>} : vector<16x32xf32>, vector<64x32xf32>, vector<16x64xf32> -> vector<16x64xf32>
    %cst_60 = arith.constant 0.353553385 : f32
    %137 = vector.broadcast %cst_60 : f32 to vector<16x64xf32>
    %138 = arith.mulf %136, %137 : vector<16x64xf32>
    %cst_61 = arith.constant dense<0xFF800000> : vector<16xf32>
    %139 = vector.multi_reduction <maximumf>, %138, %cst_61 [1] : vector<16x64xf32> to vector<16xf32>
    %140 = vector.shape_cast %139 : vector<16xf32> to vector<16x1xf32>
    %141 = vector.broadcast %140 : vector<16x1xf32> to vector<16x64xf32>
    %142 = arith.subf %138, %141 : vector<16x64xf32>
    %143 = math.exp %142 : vector<16x64xf32>
    %144 = arith.mulf %143, %1 : vector<16x64xf32>
    %cst_62 = arith.constant dense<0.000000e+00> : vector<16x64xf32>
    %145 = tpu.matmul %144, %2, %cst_62 {dimension_numbers = #tpu.dot_dimension_numbers<[1], [0], [0], [1], [0, 0, 1, 1], [], []>} : vector<16x64xf32>, vector<64x64xf32>, vector<16x64xf32> -> vector<16x64xf32>
    %cst_63 = arith.constant 1.000000e+00 : f32
    %146 = vector.broadcast %cst_63 : f32 to vector<16x64xf32>
    %147 = arith.subf %146, %1 : vector<16x64xf32>
    %148 = arith.addf %145, %147 : vector<16x64xf32>
    %149 = arith.divf %144, %148 : vector<16x64xf32>
    %cst_64 = arith.constant dense<0.000000e+00> : vector<16x32xf32>
    %150 = tpu.matmul %149, %135, %cst_64 {dimension_numbers = #tpu.dot_dimension_numbers<[1], [0], [0], [1], [0, 0, 1, 1], [], []>} : vector<16x64xf32>, vector<64x32xf32>, vector<16x32xf32> -> vector<16x32xf32>
    %cst_65 = arith.constant dense<0.000000e+00> : vector<16x32xf32>
    %151 = tpu.matmul %150, %115, %cst_65 {dimension_numbers = #tpu.dot_dimension_numbers<[1], [0], [0], [1], [0, 0, 1, 1], [], []>} : vector<16x32xf32>, vector<32x32xf32>, vector<16x32xf32> -> vector<16x32xf32>
    %152 = vector.broadcast %119 : vector<1x32xf32> to vector<16x32xf32>
    %153 = arith.addf %151, %152 : vector<16x32xf32>
    %154 = arith.addf %113, %153 : vector<16x32xf32>
    %cst_66 = arith.constant dense<0.000000e+00> : vector<16xf32>
    %155 = vector.multi_reduction <add>, %154, %cst_66 [1] : vector<16x32xf32> to vector<16xf32>
    %156 = vector.shape_cast %155 : vector<16xf32> to vector<16x1xf32>
    %cst_67 = arith.constant 3.200000e+01 : f32
    %157 = vector.broadcast %cst_67 : f32 to vector<16x1xf32>
    %158 = arith.divf %156, %157 : vector<16x1xf32>
    %159 = vector.broadcast %158 : vector<16x1xf32> to vector<16x32xf32>
    %160 = arith.subf %154, %159 : vector<16x32xf32>
    %161 = arith.mulf %160, %160 : vector<16x32xf32>
    %cst_68 = arith.constant dense<0.000000e+00> : vector<16xf32>
    %162 = vector.multi_reduction <add>, %161, %cst_68 [1] : vector<16x32xf32> to vector<16xf32>
    %163 = vector.shape_cast %162 : vector<16xf32> to vector<16x1xf32>
    %cst_69 = arith.constant 3.200000e+01 : f32
    %164 = vector.broadcast %cst_69 : f32 to vector<16x1xf32>
    %165 = arith.divf %163, %164 : vector<16x1xf32>
    %166 = vector.broadcast %158 : vector<16x1xf32> to vector<16x32xf32>
    %167 = arith.subf %154, %166 : vector<16x32xf32>
    %cst_70 = arith.constant 9.99999974E-6 : f32
    %168 = vector.broadcast %cst_70 : f32 to vector<16x1xf32>
    %169 = arith.addf %165, %168 : vector<16x1xf32>
    %170 = math.rsqrt %169 : vector<16x1xf32>
    %171 = vector.broadcast %170 : vector<16x1xf32> to vector<16x32xf32>
    %172 = arith.mulf %167, %171 : vector<16x32xf32>
    %173 = vector.broadcast %120 : vector<1x32xf32> to vector<16x32xf32>
    %174 = arith.mulf %172, %173 : vector<16x32xf32>
    %175 = vector.broadcast %121 : vector<1x32xf32> to vector<16x32xf32>
    %176 = arith.addf %174, %175 : vector<16x32xf32>
    %cst_71 = arith.constant dense<0.000000e+00> : vector<16x64xf32>
    %177 = tpu.matmul %176, %116, %cst_71 {dimension_numbers = #tpu.dot_dimension_numbers<[1], [0], [0], [1], [0, 0, 1, 1], [], []>} : vector<16x32xf32>, vector<32x64xf32>, vector<16x64xf32> -> vector<16x64xf32>
    %178 = vector.broadcast %122 : vector<1x64xf32> to vector<16x64xf32>
    %179 = arith.addf %177, %178 : vector<16x64xf32>
    %180 = arith.mulf %179, %179 : vector<16x64xf32>
    %181 = arith.mulf %179, %180 : vector<16x64xf32>
    %cst_72 = arith.constant 4.471500e-02 : f32
    %182 = vector.broadcast %cst_72 : f32 to vector<16x64xf32>
    %183 = arith.mulf %182, %181 : vector<16x64xf32>
    %184 = arith.addf %179, %183 : vector<16x64xf32>
    %cst_73 = arith.constant 0.797884583 : f32
    %185 = vector.broadcast %cst_73 : f32 to vector<16x64xf32>
    %186 = arith.mulf %185, %184 : vector<16x64xf32>
    %187 = math.tanh %186 : vector<16x64xf32>
    %cst_74 = arith.constant 1.000000e+00 : f32
    %188 = vector.broadcast %cst_74 : f32 to vector<16x64xf32>
    %189 = arith.addf %188, %187 : vector<16x64xf32>
    %cst_75 = arith.constant 5.000000e-01 : f32
    %190 = vector.broadcast %cst_75 : f32 to vector<16x64xf32>
    %191 = arith.mulf %190, %189 : vector<16x64xf32>
    %192 = arith.mulf %179, %191 : vector<16x64xf32>
    %cst_76 = arith.constant dense<0.000000e+00> : vector<16x32xf32>
    %193 = tpu.matmul %192, %117, %cst_76 {dimension_numbers = #tpu.dot_dimension_numbers<[1], [0], [0], [1], [0, 0, 1, 1], [], []>} : vector<16x64xf32>, vector<64x32xf32>, vector<16x32xf32> -> vector<16x32xf32>
    %194 = vector.broadcast %123 : vector<1x32xf32> to vector<16x32xf32>
    %195 = arith.addf %193, %194 : vector<16x32xf32>
    %196 = arith.addf %176, %195 : vector<16x32xf32>
    %cst_77 = arith.constant dense<0.000000e+00> : vector<16xf32>
    %197 = vector.multi_reduction <add>, %196, %cst_77 [1] : vector<16x32xf32> to vector<16xf32>
    %198 = vector.shape_cast %197 : vector<16xf32> to vector<16x1xf32>
    %cst_78 = arith.constant 3.200000e+01 : f32
    %199 = vector.broadcast %cst_78 : f32 to vector<16x1xf32>
    %200 = arith.divf %198, %199 : vector<16x1xf32>
    %201 = vector.broadcast %200 : vector<16x1xf32> to vector<16x32xf32>
    %202 = arith.subf %196, %201 : vector<16x32xf32>
    %203 = arith.mulf %202, %202 : vector<16x32xf32>
    %cst_79 = arith.constant dense<0.000000e+00> : vector<16xf32>
    %204 = vector.multi_reduction <add>, %203, %cst_79 [1] : vector<16x32xf32> to vector<16xf32>
    %205 = vector.shape_cast %204 : vector<16xf32> to vector<16x1xf32>
    %cst_80 = arith.constant 3.200000e+01 : f32
    %206 = vector.broadcast %cst_80 : f32 to vector<16x1xf32>
    %207 = arith.divf %205, %206 : vector<16x1xf32>
    %208 = vector.broadcast %200 : vector<16x1xf32> to vector<16x32xf32>
    %209 = arith.subf %196, %208 : vector<16x32xf32>
    %cst_81 = arith.constant 9.99999974E-6 : f32
    %210 = vector.broadcast %cst_81 : f32 to vector<16x1xf32>
    %211 = arith.addf %207, %210 : vector<16x1xf32>
    %212 = math.rsqrt %211 : vector<16x1xf32>
    %213 = vector.broadcast %212 : vector<16x1xf32> to vector<16x32xf32>
    %214 = arith.mulf %209, %213 : vector<16x32xf32>
    %215 = vector.broadcast %124 : vector<1x32xf32> to vector<16x32xf32>
    %216 = arith.mulf %214, %215 : vector<16x32xf32>
    %217 = vector.broadcast %125 : vector<1x32xf32> to vector<16x32xf32>
    %218 = arith.addf %216, %217 : vector<16x32xf32>
    %c32 = arith.constant 32 : index
    %c0_82 = arith.constant 0 : index
    %219 = vector.load %arg2[%c32, %c0_82] : memref<186x128xf32, #tpu.memory_space<vmem>>, vector<1x32xf32>
    %c33 = arith.constant 33 : index
    %c0_83 = arith.constant 0 : index
    %220 = vector.load %arg2[%c33, %c0_83] : memref<186x128xf32, #tpu.memory_space<vmem>>, vector<1x32xf32>
    %cst_84 = arith.constant dense<0.000000e+00> : vector<16xf32>
    %221 = vector.multi_reduction <add>, %218, %cst_84 [1] : vector<16x32xf32> to vector<16xf32>
    %222 = vector.shape_cast %221 : vector<16xf32> to vector<16x1xf32>
    %cst_85 = arith.constant 3.200000e+01 : f32
    %223 = vector.broadcast %cst_85 : f32 to vector<16x1xf32>
    %224 = arith.divf %222, %223 : vector<16x1xf32>
    %225 = vector.broadcast %224 : vector<16x1xf32> to vector<16x32xf32>
    %226 = arith.subf %218, %225 : vector<16x32xf32>
    %227 = arith.mulf %226, %226 : vector<16x32xf32>
    %cst_86 = arith.constant dense<0.000000e+00> : vector<16xf32>
    %228 = vector.multi_reduction <add>, %227, %cst_86 [1] : vector<16x32xf32> to vector<16xf32>
    %229 = vector.shape_cast %228 : vector<16xf32> to vector<16x1xf32>
    %cst_87 = arith.constant 3.200000e+01 : f32
    %230 = vector.broadcast %cst_87 : f32 to vector<16x1xf32>
    %231 = arith.divf %229, %230 : vector<16x1xf32>
    %232 = vector.broadcast %224 : vector<16x1xf32> to vector<16x32xf32>
    %233 = arith.subf %218, %232 : vector<16x32xf32>
    %cst_88 = arith.constant 9.99999974E-6 : f32
    %234 = vector.broadcast %cst_88 : f32 to vector<16x1xf32>
    %235 = arith.addf %231, %234 : vector<16x1xf32>
    %236 = math.rsqrt %235 : vector<16x1xf32>
    %237 = vector.broadcast %236 : vector<16x1xf32> to vector<16x32xf32>
    %238 = arith.mulf %233, %237 : vector<16x32xf32>
    %239 = vector.broadcast %219 : vector<1x32xf32> to vector<16x32xf32>
    %240 = arith.mulf %238, %239 : vector<16x32xf32>
    %241 = vector.broadcast %220 : vector<1x32xf32> to vector<16x32xf32>
    %242 = arith.addf %240, %241 : vector<16x32xf32>
    %cst_89 = arith.constant dense<0.000000e+00> : vector<2x32xf32>
    %243 = tpu.matmul %3, %242, %cst_89 {dimension_numbers = #tpu.dot_dimension_numbers<[1], [0], [0], [1], [0, 0, 1, 1], [], []>} : vector<2x16xf32>, vector<16x32xf32>, vector<2x32xf32> -> vector<2x32xf32>
    %c34 = arith.constant 34 : index
    %c0_90 = arith.constant 0 : index
    %244 = vector.load %arg2[%c34, %c0_90] : memref<186x128xf32, #tpu.memory_space<vmem>>, vector<1x32xf32>
    %c35 = arith.constant 35 : index
    %c0_91 = arith.constant 0 : index
    %245 = vector.load %arg2[%c35, %c0_91] : memref<186x128xf32, #tpu.memory_space<vmem>>, vector<1x32xf32>
    %cst_92 = arith.constant dense<0.000000e+00> : vector<2xf32>
    %246 = vector.multi_reduction <add>, %243, %cst_92 [1] : vector<2x32xf32> to vector<2xf32>
    %247 = vector.shape_cast %246 : vector<2xf32> to vector<2x1xf32>
    %cst_93 = arith.constant 3.200000e+01 : f32
    %248 = vector.broadcast %cst_93 : f32 to vector<2x1xf32>
    %249 = arith.divf %247, %248 : vector<2x1xf32>
    %250 = vector.broadcast %249 : vector<2x1xf32> to vector<2x32xf32>
    %251 = arith.subf %243, %250 : vector<2x32xf32>
    %252 = arith.mulf %251, %251 : vector<2x32xf32>
    %cst_94 = arith.constant dense<0.000000e+00> : vector<2xf32>
    %253 = vector.multi_reduction <add>, %252, %cst_94 [1] : vector<2x32xf32> to vector<2xf32>
    %254 = vector.shape_cast %253 : vector<2xf32> to vector<2x1xf32>
    %cst_95 = arith.constant 3.200000e+01 : f32
    %255 = vector.broadcast %cst_95 : f32 to vector<2x1xf32>
    %256 = arith.divf %254, %255 : vector<2x1xf32>
    %257 = vector.broadcast %249 : vector<2x1xf32> to vector<2x32xf32>
    %258 = arith.subf %243, %257 : vector<2x32xf32>
    %cst_96 = arith.constant 9.99999974E-6 : f32
    %259 = vector.broadcast %cst_96 : f32 to vector<2x1xf32>
    %260 = arith.addf %256, %259 : vector<2x1xf32>
    %261 = math.rsqrt %260 : vector<2x1xf32>
    %262 = vector.broadcast %261 : vector<2x1xf32> to vector<2x32xf32>
    %263 = arith.mulf %258, %262 : vector<2x32xf32>
    %264 = vector.broadcast %244 : vector<1x32xf32> to vector<2x32xf32>
    %265 = arith.mulf %263, %264 : vector<2x32xf32>
    %266 = vector.broadcast %245 : vector<1x32xf32> to vector<2x32xf32>
    %267 = arith.addf %265, %266 : vector<2x32xf32>
    %c512 = arith.constant 512 : index
    %c0_97 = arith.constant 0 : index
    %268 = vector.load %arg1[%c512, %c0_97] : memref<640x128xf32, #tpu.memory_space<vmem>>, vector<32x32xf32>
    %cst_98 = arith.constant dense<0.000000e+00> : vector<2x32xf32>
    %269 = tpu.matmul %267, %268, %cst_98 {dimension_numbers = #tpu.dot_dimension_numbers<[1], [0], [0], [1], [0, 0, 1, 1], [], []>} : vector<2x32xf32>, vector<32x32xf32>, vector<2x32xf32> -> vector<2x32xf32>
    %c36 = arith.constant 36 : index
    %c0_99 = arith.constant 0 : index
    %270 = vector.load %arg2[%c36, %c0_99] : memref<186x128xf32, #tpu.memory_space<vmem>>, vector<1x32xf32>
    %271 = vector.broadcast %270 : vector<1x32xf32> to vector<2x32xf32>
    %272 = arith.addf %269, %271 : vector<2x32xf32>
    %c512_100 = arith.constant 512 : index
    %c32_101 = arith.constant 32 : index
    %273 = vector.load %arg1[%c512_100, %c32_101] : memref<640x128xf32, #tpu.memory_space<vmem>>, vector<32x96xf32>
    %cst_102 = arith.constant dense<0.000000e+00> : vector<2x96xf32>
    %274 = tpu.matmul %272, %273, %cst_102 {dimension_numbers = #tpu.dot_dimension_numbers<[1], [0], [0], [1], [0, 0, 1, 1], [], []>} : vector<2x32xf32>, vector<32x96xf32>, vector<2x96xf32> -> vector<2x96xf32>
    %c37 = arith.constant 37 : index
    %c0_103 = arith.constant 0 : index
    %275 = vector.load %arg2[%c37, %c0_103] : memref<186x128xf32, #tpu.memory_space<vmem>>, vector<1x96xf32>
    %276 = vector.broadcast %275 : vector<1x96xf32> to vector<2x96xf32>
    %277 = arith.addf %274, %276 : vector<2x96xf32>
    %cst_104 = arith.constant 0.000000e+00 : f32
    %278 = vector.broadcast %cst_104 : f32 to vector<2x96xf32>
    %279 = arith.maximumf %277, %278 : vector<2x96xf32>
    %c544 = arith.constant 544 : index
    %c0_105 = arith.constant 0 : index
    %280 = vector.load %arg1[%c544, %c0_105] : memref<640x128xf32, #tpu.memory_space<vmem>>, vector<96x44xf32>
    %cst_106 = arith.constant dense<0.000000e+00> : vector<2x44xf32>
    %281 = tpu.matmul %279, %280, %cst_106 {dimension_numbers = #tpu.dot_dimension_numbers<[1], [0], [0], [1], [0, 0, 1, 1], [], []>} : vector<2x96xf32>, vector<96x44xf32>, vector<2x44xf32> -> vector<2x44xf32>
    %c38 = arith.constant 38 : index
    %c0_107 = arith.constant 0 : index
    %282 = vector.load %arg2[%c38, %c0_107] : memref<186x128xf32, #tpu.memory_space<vmem>>, vector<1x44xf32>
    %283 = vector.broadcast %282 : vector<1x44xf32> to vector<2x44xf32>
    %284 = arith.addf %281, %283 : vector<2x44xf32>
    %285 = vector.extract_strided_slice %284 {offsets = [0, 0], sizes = [2, 4], strides = [1, 1]} : vector<2x44xf32> to vector<2x4xf32>
    %286 = math.tanh %285 : vector<2x4xf32>
    %287 = vector.extract_strided_slice %284 {offsets = [0, 4], sizes = [2, 12], strides = [1, 1]} : vector<2x44xf32> to vector<2x12xf32>
    %288 = vector.extract_strided_slice %284 {offsets = [0, 16], sizes = [2, 4], strides = [1, 1]} : vector<2x44xf32> to vector<2x4xf32>
    %289 = vector.extract_strided_slice %284 {offsets = [0, 20], sizes = [2, 4], strides = [1, 1]} : vector<2x44xf32> to vector<2x4xf32>
    %290 = vector.extract_strided_slice %284 {offsets = [0, 24], sizes = [2, 4], strides = [1, 1]} : vector<2x44xf32> to vector<2x4xf32>
    %291 = vector.extract_strided_slice %284 {offsets = [0, 28], sizes = [2, 4], strides = [1, 1]} : vector<2x44xf32> to vector<2x4xf32>
    %292 = vector.extract_strided_slice %284 {offsets = [0, 32], sizes = [2, 4], strides = [1, 1]} : vector<2x44xf32> to vector<2x4xf32>
    %293 = vector.extract_strided_slice %284 {offsets = [0, 36], sizes = [2, 4], strides = [1, 1]} : vector<2x44xf32> to vector<2x4xf32>
    %294 = vector.extract_strided_slice %284 {offsets = [0, 40], sizes = [2, 4], strides = [1, 1]} : vector<2x44xf32> to vector<2x4xf32>
    %295 = math.tanh %294 : vector<2x4xf32>
    %296 = arith.maximumf %288, %289 : vector<2x4xf32>
    %297 = arith.maximumf %296, %290 : vector<2x4xf32>
    %298 = arith.subf %288, %297 : vector<2x4xf32>
    %299 = math.exp %298 : vector<2x4xf32>
    %300 = arith.subf %289, %297 : vector<2x4xf32>
    %301 = math.exp %300 : vector<2x4xf32>
    %302 = arith.subf %290, %297 : vector<2x4xf32>
    %303 = math.exp %302 : vector<2x4xf32>
    %304 = arith.addf %299, %301 : vector<2x4xf32>
    %305 = arith.addf %304, %303 : vector<2x4xf32>
    %306 = arith.maximumf %299, %301 : vector<2x4xf32>
    %307 = arith.maximumf %306, %303 : vector<2x4xf32>
    %308 = arith.divf %307, %305 : vector<2x4xf32>
    %309 = arith.cmpf oge, %299, %301 : vector<2x4xf32>
    %310 = arith.cmpf oge, %299, %303 : vector<2x4xf32>
    %311 = arith.andi %309, %310 : vector<2x4xi1>
    %312 = arith.cmpf oge, %301, %303 : vector<2x4xf32>
    %cst_108 = arith.constant 1.000000e+00 : f32
    %cst_109 = arith.constant 2.000000e+00 : f32
    %313 = vector.broadcast %cst_108 : f32 to vector<2x4xf32>
    %314 = vector.broadcast %cst_109 : f32 to vector<2x4xf32>
    %315 = arith.select %312, %313, %314 : vector<2x4xi1>, vector<2x4xf32>
    %cst_110 = arith.constant 0.000000e+00 : f32
    %316 = vector.broadcast %cst_110 : f32 to vector<2x4xf32>
    %317 = arith.select %311, %316, %315 : vector<2x4xi1>, vector<2x4xf32>
    %cst_111 = arith.constant 4.500000e-01 : f32
    %318 = vector.broadcast %cst_111 : f32 to vector<2x4xf32>
    %319 = arith.cmpf olt, %308, %318 : vector<2x4xf32>
    %cst_112 = arith.constant 2.000000e+00 : f32
    %320 = vector.broadcast %cst_112 : f32 to vector<2x4xf32>
    %321 = arith.select %319, %320, %317 : vector<2x4xi1>, vector<2x4xf32>
    %322 = tpu.concatenate %286, %321, %291, %292, %293 in 1 : vector<2x4xf32>, vector<2x4xf32>, vector<2x4xf32>, vector<2x4xf32>, vector<2x4xf32> -> vector<2x20xf32>
    %cst_113 = arith.constant -1.000000e+01 : f32
    %cst_114 = arith.constant 1.000000e+01 : f32
    %323 = vector.broadcast %cst_113 : f32 to vector<2x20xf32>
    %324 = arith.maximumf %323, %322 : vector<2x20xf32>
    %325 = vector.broadcast %cst_114 : f32 to vector<2x20xf32>
    %326 = arith.minimumf %325, %324 : vector<2x20xf32>
    %c0_115 = arith.constant 0 : index
    %c0_116 = arith.constant 0 : index
    %327 = vector.load %arg3[%c0_115, %c0_116] : memref<2x20xf32, #tpu.memory_space<vmem>>, vector<2x20xf32>
    tpu.vector_store %arg3[%c0_115, %c0_116], %326 {strides = array<i32>} : memref<2x20xf32, #tpu.memory_space<vmem>>, vector<2x20xf32>,
    %c0_117 = arith.constant 0 : index
    %c0_118 = arith.constant 0 : index
    %328 = vector.load %arg4[%c0_117, %c0_118] : memref<2x12xf32, #tpu.memory_space<vmem>>, vector<2x12xf32>
    tpu.vector_store %arg4[%c0_117, %c0_118], %287 {strides = array<i32>} : memref<2x12xf32, #tpu.memory_space<vmem>>, vector<2x12xf32>,
    %c0_119 = arith.constant 0 : index
    %c0_120 = arith.constant 0 : index
    %329 = vector.load %arg5[%c0_119, %c0_120] : memref<2x4xf32, #tpu.memory_space<vmem>>, vector<2x4xf32>
    tpu.vector_store %arg5[%c0_119, %c0_120], %295 {strides = array<i32>} : memref<2x4xf32, #tpu.memory_space<vmem>>, vector<2x4xf32>,
    return
  }
}

</mosaic_0001>

<bundles_post_ra>
// kernel: forward.1
= control target key start
LH: loop header
LB: loop body
LE: loop exit
PB: predicated region body
PF: predicated region fallthrough
CT: control target
= control target key end

     0   :  { %11 = vsyncpa [#allocation3], 0  ;;  %s2597_s0 = inlined_call_operand.vmem [shape: f32[16,256], index: 0, kind: input, shape index: {}]   ;;  %s2598_s1 = inlined_call_operand.vmem [shape: f32[640,128], index: 1, kind: input, shape index: {}]   ;;  %s2599_s2 = inlined_call_operand.vmem [shape: f32[186,128], index: 2, kind: input, shape index: {}]   ;;  %s2600_s3 = inlined_call_operand.hbm [shape: f32[2,20], index: 3, kind: output, shape index: {0}]   ;;  %s2601_s4 = inlined_call_operand.vmem [shape: f32[2,12], index: 4, kind: output, shape index: {1}]   ;;  %s2602_s5 = inlined_call_operand.hbm [shape: f32[2,4], index: 5, kind: output, shape index: {2}]  }
   0x1   :  { %v57_v0 = vld [vmem:[%s2598_s1 + $0x78] sm:$0xff]  ;;  %v56_v1 = vld [vmem:[%s2598_s1 + $0x70] sm:$0xff]  ;;  %v55_v4 = vld [vmem:[%s2598_s1 + $0x68] sm:$0xff] }
   0x2   :  { %v73_v2 = vld [vmem:[%s2598_s1 + $0xf8] sm:$0xff]  ;;  %76 = vmatpush.msra.mxu0 %v57_v0  ;;  %v72_v3 = vld [vmem:[%s2598_s1 + $0xf0] sm:$0xff]  ;;  %v71_v5 = vld [vmem:[%s2598_s1 + $0xe8] sm:$0xff] }
   0x3   :  { %99 = vmatpush.msra.mxu1 %v73_v2  ;;  %v54_v6 = vld [vmem:[%s2598_s1 + $0x60] sm:$0xff]  ;;  %v53_v8 = vld [vmem:[%s2598_s1 + $0x58] sm:$0xff]  ;;  %v52_v10 = vld [vmem:[%s2598_s1 + $0x50] sm:$0xff] }
   0x4   :  { %77 = vmatpush.msra.mxu0 %v56_v1  ;;  %v70_v7 = vld [vmem:[%s2598_s1 + $0xe0] sm:$0xff]  ;;  %v69_v9 = vld [vmem:[%s2598_s1 + $0xd8] sm:$0xff]  ;;  %v68_v11 = vld [vmem:[%s2598_s1 + $0xd0] sm:$0xff] }
   0x5   :  { %100 = vmatpush.msra.mxu1 %v72_v3  ;;  %v51_v12 = vld [vmem:[%s2598_s1 + $0x48] sm:$0xff]  ;;  %v50_v14 = vld [vmem:[%s2598_s1 + $0x40] sm:$0xff]  ;;  %v49_v16 = vld [vmem:[%s2598_s1 + $0x38] sm:$0xff] }
   0x6   :  { %78 = vmatpush.msra.mxu0 %v55_v4  ;;  %v67_v13 = vld [vmem:[%s2598_s1 + $0xc8] sm:$0xff]  ;;  %v66_v15 = vld [vmem:[%s2598_s1 + $0xc0] sm:$0xff]  ;;  %v65_v17 = vld [vmem:[%s2598_s1 + $0xb8] sm:$0xff] }
   0x7   :  { %101 = vmatpush.msra.mxu1 %v71_v5  ;;  %v1906_v18 = vld [vmem:[%s2598_s1 + $0x118] sm:$0xff]  ;;  %v48_v19 = vld [vmem:[%s2598_s1 + $0x30] sm:$0xff]  ;;  %v47_v21 = vld [vmem:[%s2598_s1 + $0x28] sm:$0xff] }
   0x8   :  { %79 = vmatpush.msra.mxu0 %v54_v6  ;;  %v64_v20 = vld [vmem:[%s2598_s1 + $0xb0] sm:$0xff]  ;;  %166 = vmatpush.msra.mxu2 %v1906_v18  ;;  %v63_v22 = vld [vmem:[%s2598_s1 + $0xa8] sm:$0xff]  ;;  %v46_v23 = vld [vmem:[%s2598_s1 + $0x20] sm:$0xff] }
   0x9   :  { %102 = vmatpush.msra.mxu1 %v70_v7  ;;  %v62_v24 = vld [vmem:[%s2598_s1 + $0xa0] sm:$0xff] }
   0xa   :  { %80 = vmatpush.msra.mxu0 %v53_v8 }
   0xb   :  { %103 = vmatpush.msra.mxu1 %v69_v9 }
   0xc   :  { %81 = vmatpush.msra.mxu0 %v52_v10 }
   0xd   :  { %104 = vmatpush.msra.mxu1 %v68_v11 }
   0xe   :  { %82 = vmatpush.msra.mxu0 %v51_v12 }
   0xf   :  { %105 = vmatpush.msra.mxu1 %v67_v13 }
  0x10   :  { %83 = vmatpush.msra.mxu0 %v50_v14 }
  0x11   :  { %106 = vmatpush.msra.mxu1 %v66_v15 }
  0x12   :  { %84 = vmatpush.msra.mxu0 %v49_v16 }
  0x13   :  { %107 = vmatpush.msra.mxu1 %v65_v17 }
  0x14   :  { %85 = vmatpush.msra.mxu0 %v48_v19 }
  0x15   :  { %108 = vmatpush.msra.mxu1 %v64_v20 }
  0x16   :  { %12 = vsyncpa [#allocation5], 0  ;;  %86 = vmatpush.msra.mxu0 %v47_v21  ;;  %v45_v25 = vld [vmem:[%s2598_s1 + $0x18] sm:$0xff]  ;;  %v44_v27 = vld [vmem:[%s2598_s1 + $0x10] sm:$0xff]  ;;  %s1805_s24 = smov 32   ;;  %vm147_vm0 = vcmask 261120  }
  0x17   :  { %109 = vmatpush.msra.mxu1 %v63_v22  ;;  %v61_v26 = vld [vmem:[%s2598_s1 + $0x98] sm:$0xff]  ;;  %v60_v28 = vld [vmem:[%s2598_s1 + $0x90] sm:$0xff]  ;;  %v43_v29 = vld [vmem:[%s2598_s1 + $0x8] sm:$0xff]  ;;  %s1806_s20 = smov 96   ;;  %s1807_s21 = smov 64   ;;  %vm320_vm1 = vcmask 523264  }
  0x18   :  { %87 = vmatpush.msra.mxu0 %v46_v23  ;;  %v59_v30 = vld [vmem:[%s2598_s1 + $0x88] sm:$0xff]  ;;  %v42_v31 = vld [vmem:[%s2598_s1] sm:$0xff]  ;;  %v40_v35 = vld [vmem:[%s2597_s0 + $0x10] sm:$0xff]  ;;  %s1809_s28 = smov 120   ;;  %s1810_s29 = smov 124  }
  0x19   :  { %110 = vmatpush.msra.mxu1 %v62_v24  ;;  %v58_v32 = vld [vmem:[%s2598_s1 + $0x80] sm:$0xff]  ;;  %v39_v34 = vld [vmem:[%s2597_s0 + $0x8] sm:$0xff]  ;;  %v41_v36 = vld [vmem:[%s2597_s0 + $0x18] sm:$0xff]  ;;  %s1811_s6 = smov 4   ;;  %s1812_s7 = smov 8  }
  0x1a   :  { %88 = vmatpush.msra.mxu0 %v45_v25  ;;  %v38_v33 = vld [vmem:[%s2597_s0] sm:$0xff]  ;;  %v1966_v37 = vld [vmem:[%s2598_s1 + $0x110] sm:$0xff]  ;;  %v1972_v38 = vld [vmem:[%s2598_s1 + $0x108] sm:$0xff]  ;;  %s1816_s8 = smov 116   ;;  %s1817_s9 = smov [#allocation4]  }
  0x1b   :  { %111 = vmatpush.msra.mxu1 %v61_v26  ;;  %167 = vmatpush.msra.mxu2 %v1966_v37  ;;  %v1978_v39 = vld [vmem:[%s2598_s1 + $0x100] sm:$0xff]  ;;  %v24_v41 = vld [vmem:[%s2599_s2 + $0x50] sm:$0xff]  ;;  %v23_v43 = vld [vmem:[%s2599_s2 + $0x48] sm:$0xff]  ;;  %s1521_s10 = sshll.u32 %s1817_s9, 4  ;;  %s1523_s13 = sshll.u32 %s2602_s5, 4  ;;  %s1522_s10 = int_to_ptr.vmem [resolvable:$true] %s1521_s10  ;;  %s1524_s13 = int_to_ptr.hbm [resolvable:$true] %s1523_s13 }
  0x1c   :  { %89 = vmatpush.msra.mxu0 %v44_v27  ;;  %v1627_v40 = vpack.i.bf16 %v1978_v39, %v1972_v38  ;;  %195 = vrot.lane.b32.xlu1 %v24_v41, %s1805_s24  ;;  %v26_v42 = vld [vmem:[%s2599_s2 + $0x60] sm:$0xff]  ;;  %v25_v45 = vld [vmem:[%s2599_s2 + $0x58] sm:$0xff]  ;;  %v19_v47 = vld [vmem:[%s2599_s2 + $0x28] sm:$0xff]  ;;  %s1818_s14 = smov [#allocation2]   ;;  %s1510_s18 = sshll.u32 %s2600_s3, 4  ;;  %s1511_s18 = int_to_ptr.hbm [resolvable:$true] %s1510_s18 }
  0x1d   :  { %112 = vmatpush.msra.mxu1 %v60_v28  ;;  %168 = vmatpush.msra.mxu2 %v1972_v38  ;;  %v22_v44 = vld [vmem:[%s2599_s2 + $0x40] sm:$0xff]  ;;  %v2005_v46 = vld [vmem:[%s2599_s2 + $0x38] sm:$0xff]  ;;  %v2017_v48 = vld [vmem:[%s2599_s2 + $0x30] sm:$0xff]  ;;  %s1508_s15 = sshll.u32 %s1818_s14, 4  ;;  %s1509_s15 = int_to_ptr.vmem [resolvable:$true] %s1508_s15 }
  0x1e   :  { %90 = vmatpush.msra.mxu0 %v43_v29  ;;  %199 = vrot.lane.b32.xlu0 %v26_v42, %s1805_s24  ;;  %v74_v49 = vld [vmem:[%s2599_s2] sm:$0xff]  ;;  %v75_v54 = vld [vmem:[%s2599_s2 + $0x8] sm:$0xff]  ;;  %v1672_v61 = vld [vmem:[%s2599_s2 + $0x10] ss:$0 sm:$0xff] }
  0x1f   :  { %113 = vmatpush.msra.mxu1 %v59_v30  ;;  %169 = vmatpush.msra.mxu2 %v1978_v39  ;;  %v2109_v29 = vld [vmem:[%s2599_s2 + $0xb0] sm:$0xff]  ;;  %v2114_v30 = vld [vmem:[%s2599_s2 + $0xa8] sm:$0xff] }
  0x20   :  { %91 = vmatpush.msra.mxu0 %v42_v31  ;;  %191 = vrot.lane.b32.xlu2 %v22_v44, %s1805_s24 }
  0x21   :  { %114 = vmatpush.msra.mxu1 %v58_v32  ;;  %92 = vmatmul.f32.vlgmr.msra.gmra.mxu0 %v38_v33  ;;  %v2120_v32 = vld [vmem:[%s2599_s2 + $0xa0] sm:$0xff]  ;;  %v2127_v33 = vld [vmem:[%s2599_s2 + $0x98] sm:$0xff] }
  0x22   :  { %115 = vmatmul.f32.vlgmr.msra.gmra.mxu1 %v39_v34  ;;  %351 = vmatpush.msrb.mxu2 %v2109_v29  ;;  %v2133_v34 = vld [vmem:[%s2599_s2 + $0x90] sm:$0xff] }
  0x24   :  { %193 = vrot.lane.b32.xlu1 %v23_v43, %s1805_s24  ;;  %352 = vmatpush.msrb.mxu2 %v2114_v30 }
  0x26   :  { %197 = vrot.lane.b32.xlu0 %v25_v45, %s1805_s24  ;;  %353 = vmatpush.msrb.mxu2 %v2120_v32 }
  0x28   :  { %189 = vrot.lane.b32.xlu2 %v2005_v46, %s1805_s24  ;;  %354 = vmatpush.msrb.mxu2 %v2127_v33 }
  0x29   :  { %95 = vmatmul.f32.gmra.mxu0 %v40_v35 }
  0x2a   :  { %118 = vmatmul.f32.gmra.mxu1 %v41_v36  ;;  %v2143_v36 = vld [vmem:[%s2599_s2 + $0x88] sm:$0xff]  ;;  %355 = vmatpush.msrb.mxu2 %v2133_v34 }
  0x2c   :  { %185 = vrot.lane.b32.xlu1 %v19_v47, %s1805_s24  ;;  %356 = vmatpush.msrb.mxu2 %v2143_v36 }
  0x2e   :  { %187 = vrot.lane.b32.xlu0 %v2017_v48, %s1805_s24 }
  0x7a   :  { %v2051_v3 = vpop.permute.xlu2 %191 }
  0x82   :  { %v2066_v10 = vpop.permute.xlu2 %189 }
  0x8e   :  { %v2037_v60 = vpop.permute.xlu1 %195 }
  0x90   :  { %v2035_v59 = vpop.permute.xlu0 %199 }
  0x96   :  { %v2049_v2 = vpop.permute.xlu1 %193 }
  0x98   :  { %v2042_v63 = vpop.permute.xlu0 %197 }
  0x9e   :  { %v93_v50 = vpop.f32.mrf.mxu0  ;;  %v2064_v9 = vpop.permute.xlu1 %185 }
  0x9f   :  { %v116_v51 = vpop.f32.mrf.mxu1  ;;  %v94_v52 = vadd.f32 %v93_v50, %v74_v49  ;;  %v2166_v49 = vld [vmem:[%s2599_s2 + $0x78] sm:$0xff] }
  0xa0   :  { %v2077_v14 = vpop.permute.xlu0 %187 }
  0xa1   :  { %v2024_v53 = vadd.f32 %v116_v51, %v94_v52 }
  0xa3   :  { %1539 = vmatmul.msk.f32.vlgmr.msra.gmra.mxu2 %vm147_vm0, %v2024_v53 }
  0xa6   :  { %v96_v55 = vpop.f32.mrf.mxu0 }
  0xa7   :  { %v119_v56 = vpop.f32.mrf.mxu1  ;;  %v97_v57 = vadd.f32 %v96_v55, %v75_v54 }
  0xa9   :  { %v2031_v58 = vadd.f32 %v119_v56, %v97_v57 }
  0xab   :  { %1540 = vmatmul.msk.f32.gmra.mxu2 %vm147_vm0, %v2031_v58 }
 0x126   :  { %v171_v62 = vpop.f32.mrf.mxu2 }
 0x127   :  { %v2044_v0 = vadd.f32 %v1672_v61, %v171_v62 }
 0x129   :  { %v215_v1 = vmul.f32 %v2042_v63, %v2044_v0  ;;  %v209_v11 = vmul.f32 %v2064_v9, %v2044_v0  ;;  %v213_v12 = vmul.f32 %v2049_v2, %v2044_v0  ;;  %v211_v13 = vmul.f32 %v2066_v10, %v2044_v0 }
 0x12b   :  { %269 = vrot.lane.b32.xlu0 %v215_v1, %s1806_s20 }
 0x12e   :  { %v174_v4 = vpop.f32.mrf.mxu2 }
 0x12f   :  { %v2053_v5 = vadd.f32 %v1672_v61, %v174_v4 }
 0x131   :  { %v216_v6 = vmul.f32 %v2035_v59, %v2053_v5  ;;  %v212_v7 = vmul.f32 %v2051_v3, %v2053_v5  ;;  %v214_v8 = vmul.f32 %v2037_v60, %v2053_v5  ;;  %v210_v15 = vmul.f32 %v2077_v14, %v2053_v5 }
 0x133   :  { %271 = vrot.lane.b32.xlu2 %v216_v6, %s1806_s20  ;;  %263 = vrot.lane.b32.xlu0 %v212_v7, %s1806_s20 }
 0x134   :  { %267 = vrot.lane.b32.xlu1 %v214_v8, %s1806_s20 }
 0x13b   :  { %265 = vrot.lane.b32.xlu2 %v213_v12, %s1806_s20  ;;  %257 = vrot.lane.b32.xlu0 %v209_v11, %s1806_s20 }
 0x13c   :  { %261 = vrot.lane.b32.xlu1 %v211_v13, %s1806_s20 }
 0x143   :  { %259 = vrot.lane.b32.xlu2 %v210_v15, %s1806_s20  ;;  %231 = vrot.lane.b32.xlu0 %v26_v42, %s1807_s21  ;;  %v2182_v15 = vld [vmem:[%s2599_s2 + $0x68] sm:$0xff] }
 0x14b   :  { %229 = vrot.lane.b32.xlu0 %v25_v45, %s1807_s21 }
 0x153   :  { %227 = vrot.lane.b32.xlu0 %v24_v41, %s1807_s21  ;;  %v2149_v41 = vld [vmem:[%s2599_s2 + $0x80] sm:$0xff] }
 0x154   :  { %357 = vmatpush.msrb.mxu2 %v2149_v41 }
 0x156   :  { %358 = vmatpush.msrb.mxu2 %v2166_v49 }
 0x15b   :  { %225 = vrot.lane.b32.xlu0 %v23_v43, %s1807_s21 }
 0x163   :  { %223 = vrot.lane.b32.xlu0 %v22_v44, %s1807_s21 }
 0x16b   :  { %217 = vrot.lane.b32.xlu0 %v19_v47, %s1807_s21  ;;  %v1622_v47 = vpack.i.bf16 %v1966_v37, %v1906_v18 }
 0x18d   :  { %v272_v16 = vpop.permute.xlu2 %271 }
 0x18e   :  { %1541 = vmatpush.xpose.msk.msra.mxu3 %vm147_vm0, %v272_v16 }
 0x195   :  { %v266_v21 = vpop.permute.xlu2 %265 }
 0x19d   :  { %v270_v17 = vpop.permute.xlu0 %269  ;;  %v260_v25 = vpop.permute.xlu2 %259 }
 0x19e   :  { %1542 = vmatpush.xpose.msk.msra.mxu3 %vm147_vm0, %v270_v17 }
 0x1a5   :  { %v264_v19 = vpop.permute.xlu0 %263 }
 0x1a6   :  { %v268_v20 = vpop.permute.xlu1 %267 }
 0x1a7   :  { %1543 = vmatpush.xpose.msk.msra.mxu3 %vm147_vm0, %v268_v20 }
 0x1ab   :  { %1544 = vmatpush.xpose.msk.msra.mxu3 %vm147_vm0, %v266_v21  ;;  %v2198_v21 = vld [vmem:[%s2599_s2 + $0x70] sm:$0xff] }
 0x1ad   :  { %v258_v22 = vpop.permute.xlu0 %257 }
 0x1ae   :  { %v262_v23 = vpop.permute.xlu1 %261 }
 0x1af   :  { %1545 = vmatpush.xpose.msk.msra.mxu3 %vm147_vm0, %v264_v19 }
 0x1b3   :  { %1546 = vmatpush.xpose.msk.msra.mxu3 %vm147_vm0, %v262_v23 }
 0x1b5   :  { %v2094_v24 = vpop.permute.xlu0 %231 }
 0x1b6   :  { %v248_v27 = vmul.f32 %v2094_v24, %v2053_v5 }
 0x1b7   :  { %1547 = vmatpush.xpose.msk.msra.mxu3 %vm147_vm0, %v260_v25 }
 0x1bb   :  { %1548 = vmatpush.xpose.msk.msra.mxu3 %vm147_vm0, %v258_v22 }
 0x1bd   :  { %v2098_v26 = vpop.permute.xlu0 %229 }
 0x1be   :  { %v247_v28 = vmul.f32 %v2098_v26, %v2044_v0  ;;  %1549 = vmatmul.msk.f32.vlgmr.msra.gmra.mxu3 %vm147_vm0, %v2044_v0 }
 0x1c0   :  { %v1602_v31 = vpack.i.bf16 %v247_v28, %v248_v27 }
 0x1c2   :  { %1603 = vrot.lane.b32.xlu0 %v1602_v31, %s1807_s21 }
 0x1c5   :  { %v2135_v35 = vpop.permute.xlu0 %227 }
 0x1c6   :  { %1550 = vmatmul.msk.f32.gmra.mxu3 %vm147_vm0, %v2053_v5  ;;  %v246_v43 = vmul.f32 %v2135_v35, %v2053_v5 }
 0x1cd   :  { %v2153_v42 = vpop.permute.xlu0 %225 }
 0x1ce   :  { %v245_v44 = vmul.f32 %v2153_v42, %v2044_v0 }
 0x1d0   :  { %v1607_v45 = vpack.i.bf16 %v245_v44, %v246_v43 }
 0x1d2   :  { %1608 = vrot.lane.b32.xlu0 %v1607_v45, %s1807_s21 }
 0x1d5   :  { %v2169_v50 = vpop.permute.xlu0 %223 }
 0x1da   :  { %1623 = vrot.lane.b32.xlu0 %v1622_v47, %s1805_s24 }
 0x1dd   :  { %v2171_v51 = vpop.permute.xlu0 %217 }
 0x1de   :  { %v241_v28 = vmul.f32 %v2171_v51, %v2044_v0 }
 0x234   :  { %v1604_v52 = vpop.permute.xlu0 %1603 }
 0x235   :  { %v1605_v54 = vunpack.i.l.bf16 %v1604_v52  ;;  %v1606_v55 = vunpack.i.h.bf16 %v1604_v52  ;;  %v335_v52 = vsub.f32 1.0, %v2182_v15 }
 0x237   :  { %442 = vmatpush.msra.mxu2 %v1605_v54 }
 0x239   :  { %443 = vmatpush.msra.mxu2 %v1606_v55 }
 0x241   :  { %v312_v56 = vpop.f32.mrf.mxu3 }
 0x242   :  { %v318_v18 = vmul.f32 0.35355338, %v312_v56 }
 0x244   :  { %v1609_v37 = vpop.permute.xlu0 %1608  ;;  %v321_v57 = vsel %vm320_vm1, %v318_v18, -inf }
 0x245   :  { %v1610_v61 = vunpack.i.l.bf16 %v1609_v37  ;;  %322 = vmax.xlane.f32.xlu1 %v321_v57  ;;  %v1611_v62 = vunpack.i.h.bf16 %v1609_v37 }
 0x247   :  { %444 = vmatpush.msra.mxu2 %v1610_v61 }
 0x249   :  { %v315_v1 = vpop.f32.mrf.mxu3  ;;  %445 = vmatpush.msra.mxu2 %v1611_v62 }
 0x24a   :  { %v319_v4 = vmul.f32 0.35355338, %v315_v1 }
 0x24c   :  { %v324_v6 = vsel %vm320_vm1, %v319_v4, -inf }
 0x24d   :  { %325 = vmax.xlane.f32.xlu2 %v324_v6 }
 0x25e   :  { %219 = vrot.lane.b32.xlu1 %v2017_v48, %s1807_s21  ;;  %v244_v48 = vmul.f32 %v2169_v50, %v2053_v5 }
 0x265   :  { %221 = vrot.lane.b32.xlu2 %v2005_v46, %s1807_s21 }
 0x2b8   :  { %v323_v7 = vpop.xlane.xlu1 %322 }
 0x2b9   :  { %v327_v8 = vsub.f32 %v318_v18, %v323_v7 }
 0x2bb   :  { %v329_v11 = vmul.f32 1.442695, %v327_v8 }
 0x2bd   :  { %1695 = vpow2.f32 %v329_v11 }
 0x2c0   :  { %v326_v12 = vpop.xlane.xlu2 %325 }
 0x2c1   :  { %v328_v13 = vsub.f32 %v319_v4, %v326_v12 }
 0x2c3   :  { %v1696_v16 = vpop.eup %1695  ;;  %v331_v17 = vmul.f32 1.442695, %v328_v13 }
 0x2c4   :  { %v2185_v19 = vmul.f32 %v1696_v16, %v2182_v15 }
 0x2c5   :  { %1697 = vpow2.f32 %v331_v17 }
 0x2c6   :  { %1551 = vmatmul.msk.f32.vlgmr.msrb.gmra.mxu2 %vm320_vm1, %v2185_v19 }
 0x2c8   :  { %v2189_v46 = vpop.permute.xlu2 %221 }
 0x2c9   :  { %v243_v20 = vmul.f32 %v2189_v46, %v2044_v0  ;;  %v1624_v0 = vpop.permute.xlu0 %1623 }
 0x2ca   :  { %v1625_v56 = vunpack.i.l.bf16 %v1624_v0 }
 0x2cb   :  { %v1698_v22 = vpop.eup %1697  ;;  %v1612_v23 = vpack.i.bf16 %v243_v20, %v244_v48 }
 0x2cc   :  { %v2201_v25 = vmul.f32 %v1698_v22, %v2198_v21  ;;  %492 = vmatpush.msrb.mxu0 %v1625_v56 }
 0x2cd   :  { %1613 = vrot.lane.b32.xlu2 %v1612_v23, %s1807_s21 }
 0x2ce   :  { %1552 = vmatmul.msk.f32.gmra.mxu2 %vm320_vm1, %v2201_v25 }
 0x2d0   :  { %v2206_v27 = vpop.permute.xlu1 %219 }
 0x2d1   :  { %v242_v31 = vmul.f32 %v2206_v27, %v2053_v5  ;;  %v1626_v5 = vunpack.i.h.bf16 %v1624_v0 }
 0x2d3   :  { %v1617_v43 = vpack.i.bf16 %v241_v28, %v242_v31  ;;  %493 = vmatpush.msrb.mxu0 %v1626_v5  ;;  %v1673_v5 = vld [vmem:[%s2599_s2 + $0x11] ss:$0 sm:$0xff] }
 0x2d5   :  { %1618 = vrot.lane.b32.xlu1 %v1617_v43, %s1807_s21  ;;  %1628 = vrot.lane.b32.xlu2 %v1627_v40, %s1805_s24  ;;  %v336_v40 = vsub.f32 1.0, %v2198_v21 }
 0x327   :  { %v1614_v44 = vpop.permute.xlu2 %1613 }
 0x328   :  { %v1615_v45 = vunpack.i.l.bf16 %v1614_v44  ;;  %v1616_v47 = vunpack.i.h.bf16 %v1614_v44 }
 0x32a   :  { %446 = vmatpush.msra.mxu2 %v1615_v45 }
 0x32c   :  { %447 = vmatpush.msra.mxu2 %v1616_v47 }
 0x32f   :  { %v1629_v18 = vpop.permute.xlu2 %1628 }
 0x330   :  { %v1630_v38 = vunpack.i.l.bf16 %v1629_v18  ;;  %v1631_v39 = vunpack.i.h.bf16 %v1629_v18 }
 0x332   :  { %494 = vmatpush.msrb.mxu0 %v1630_v38 }
 0x334   :  { %495 = vmatpush.msrb.mxu0 %v1631_v39 }
 0x347   :  { %v1619_v54 = vpop.permute.xlu1 %1618 }
 0x348   :  { %v1620_v55 = vunpack.i.l.bf16 %v1619_v54  ;;  %v1621_v57 = vunpack.i.h.bf16 %v1619_v54 }
 0x349   :  { %v360_v37 = vpop.f32.mrf.mxu2 }
 0x34a   :  { %v361_v61 = vadd.f32 %v360_v37, %v335_v52  ;;  %448 = vmatpush.msra.mxu2 %v1620_v55 }
 0x34c   :  { %1699 = vrcp.f32 %v361_v61  ;;  %449 = vmatpush.msra.mxu2 %v1621_v57  ;;  %v377_v8 = vand.u32 2147483648, %v361_v61  ;;  %v375_v12 = vand.u32 2147483647, %v361_v61  ;;  %vm371_vm3 = vweird.f32 %v361_v61 }
 0x34e   :  { %v378_v17 = vor.u32 1.1754944e-38, %v377_v8  ;;  %vm376_vm5 = vcmp.eq.f32.partialorder %v375_v12, 8.507059e+37 }
 0x351   :  { %v363_v62 = vpop.f32.mrf.mxu2 }
 0x352   :  { %v1700_v1 = vpop.eup %1699  ;;  %v364_v4 = vadd.f32 %v363_v62, %v336_v40 }
 0x353   :  { %v367_v6 = vmul.f32 %v1700_v1, %v361_v61  ;;  %vm372_vm2 = vweird.f32 %v1700_v1 }
 0x354   :  { %1701 = vrcp.f32 %v364_v4  ;;  %vm373_vm4 = vmor %vm371_vm3, %vm372_vm2  ;;  %v392_v31 = vand.u32 2147483648, %v364_v4  ;;  %v390_v44 = vand.u32 2147483647, %v364_v4  ;;  %vm386_vm7 = vweird.f32 %v364_v4 }
 0x355   :  { %v368_v7 = vsub.f32 1.0, %v367_v6 }
 0x356   :  { %v393_v47 = vor.u32 1.1754944e-38, %v392_v31  ;;  %vm391_vm9 = vcmp.eq.f32.partialorder %v390_v44, 8.507059e+37  ;;  %v129_v31 = vld [vmem:[%s2598_s1 + $0x138] sm:$0xff]  ;;  %v127_v44 = vld [vmem:[%s2598_s1 + $0x128] sm:$0xff] }
 0x357   :  { %v369_v11 = vmul.f32 %v1700_v1, %v368_v7  ;;  %581 = vmatpush.msrb.mxu1 %v129_v31 }
 0x359   :  { %v370_v13 = vadd.f32 %v1700_v1, %v369_v11 }
 0x35a   :  { %v1702_v16 = vpop.eup %1701 }
 0x35b   :  { %v382_v48 = vmul.f32 %v1702_v16, %v364_v4  ;;  %v374_v20 = vsel %vm373_vm4, %v1700_v1, %v370_v13  ;;  %vm387_vm6 = vweird.f32 %v1702_v16  ;;  %v1808_v1 = vmov 32.0  }
 0x35c   :  { %v379_v22 = vsel %vm376_vm5, %v378_v17, %v374_v20  ;;  %vm388_vm8 = vmor %vm386_vm7, %vm387_vm6  ;;  %1703 = vrcp.f32 %v1808_v1 }
 0x35d   :  { %v383_v23 = vsub.f32 1.0, %v382_v48  ;;  %v380_v28 = vmul.f32 %v379_v22, %v2185_v19 }
 0x35f   :  { %1553 = vmatmul.msk.f32.vlgmr.msra.gmra.mxu2 %vm320_vm1, %v380_v28  ;;  %v384_v43 = vmul.f32 %v1702_v16, %v383_v23 }
 0x361   :  { %v385_v45 = vadd.f32 %v1702_v16, %v384_v43  ;;  %v128_v43 = vld [vmem:[%s2598_s1 + $0x130] sm:$0xff] }
 0x362   :  { %v1704_v4 = vpop.eup %1703  ;;  %582 = vmatpush.msrb.mxu1 %v128_v43 }
 0x363   :  { %v389_v54 = vsel %vm388_vm8, %v1702_v16, %v385_v45  ;;  %v512_v6 = vmul.f32 32.0, %v1704_v4  ;;  %vm516_vm10 = vweird.f32 %v1704_v4  ;;  %v126_v45 = vld [vmem:[%s2598_s1 + $0x120] sm:$0xff] }
 0x364   :  { %v394_v0 = vsel %vm391_vm9, %v393_v47, %v389_v54  ;;  %583 = vmatpush.msrb.mxu1 %v127_v44 }
 0x365   :  { %v395_v55 = vmul.f32 %v394_v0, %v2201_v25  ;;  %v513_v7 = vsub.f32 1.0, %v512_v6 }
 0x366   :  { %584 = vmatpush.msrb.mxu1 %v126_v45 }
 0x367   :  { %1554 = vmatmul.msk.f32.gmra.mxu2 %vm320_vm1, %v395_v55  ;;  %v514_v8 = vmul.f32 %v1704_v4, %v513_v7 }
 0x368   :  { %861 = vmatpush.msra.mxu1 %v2109_v29 }
 0x369   :  { %v515_v11 = vadd.f32 %v1704_v4, %v514_v8 }
 0x36a   :  { %862 = vmatpush.msra.mxu1 %v2114_v30 }
 0x36b   :  { %v2236_v12 = vsel %vm516_vm10, %v1704_v4, %v515_v11  ;;  %v137_v11 = vld [vmem:[%s2598_s1 + $0x178] sm:$0xff] }
 0x36c   :  { %863 = vmatpush.msra.mxu1 %v2120_v32  ;;  %625 = vmatpush.msrb.mxu3 %v137_v11 }
 0x36e   :  { %864 = vmatpush.msra.mxu1 %v2127_v33 }
 0x370   :  { %865 = vmatpush.msra.mxu1 %v2133_v34 }
 0x372   :  { %866 = vmatpush.msra.mxu1 %v2143_v36  ;;  %v1674_v36 = vld [vmem:[%s2599_s2 + $0x12] ss:$0 sm:$0xff] }
 0x374   :  { %867 = vmatpush.msra.mxu1 %v2149_v41 }
 0x376   :  { %868 = vmatpush.msra.mxu1 %v2166_v49  ;;  %v1675_v49 = vld [vmem:[%s2599_s2 + $0x13] ss:$0 sm:$0xff] }
 0x3e2   :  { %v451_v56 = vpop.f32.mrf.mxu2 }
 0x3e3   :  { %1555 = vmatmul.msk.f32.vlgmr.msrb.gmra.mxu0 %vm147_vm0, %v451_v56 }
 0x3ea   :  { %v454_v19 = vpop.f32.mrf.mxu2 }
 0x3eb   :  { %1556 = vmatmul.msk.f32.gmra.mxu0 %vm147_vm0, %v454_v19 }
 0x460   :  { %v497_v18 = vpop.f32.mrf.mxu0 }
 0x461   :  { %v498_v37 = vadd.f32 %v1673_v5, %v497_v18 }
 0x463   :  { %v503_v57 = vadd.f32 %v498_v37, %v2024_v53 }
 0x465   :  { %v505_v61 = vsel %vm147_vm0, %v503_v57, 0.0 }
 0x466   :  { %506 = vadd.xlane.f32.xlu1 %v505_v61 }
 0x468   :  { %v500_v25 = vpop.f32.mrf.mxu0 }
 0x469   :  { %v501_v38 = vadd.f32 %v1673_v5, %v500_v25 }
 0x46b   :  { %v504_v39 = vadd.f32 %v501_v38, %v2031_v58 }
 0x46d   :  { %v508_v62 = vsel %vm147_vm0, %v504_v39, 0.0 }
 0x46e   :  { %509 = vadd.xlane.f32.xlu0 %v508_v62 }
 0x4d9   :  { %v507_v53 = vpop.xlane.xlu1 %506 }
 0x4da   :  { %v518_v13 = vmul.f32 %v2236_v12, %v507_v53  ;;  %v136_v53 = vld [vmem:[%s2598_s1 + $0x170] sm:$0xff] }
 0x4db   :  { %626 = vmatpush.msrb.mxu3 %v136_v53 }
 0x4dc   :  { %v520_v16 = vsub.f32 %v503_v57, %v518_v13  ;;  %v135_v13 = vld [vmem:[%s2598_s1 + $0x168] sm:$0xff] }
 0x4dd   :  { %627 = vmatpush.msrb.mxu3 %v135_v13 }
 0x4de   :  { %v522_v17 = vmul.f32 %v520_v16, %v520_v16 }
 0x4e0   :  { %v524_v58 = vsel %vm147_vm0, %v522_v17, 0.0  ;;  %v133_v17 = vld [vmem:[%s2598_s1 + $0x158] sm:$0xff] }
 0x4e1   :  { %525 = vadd.xlane.f32.xlu2 %v524_v58  ;;  %v510_v48 = vpop.xlane.xlu0 %509  ;;  %v132_v58 = vld [vmem:[%s2598_s1 + $0x150] sm:$0xff] }
 0x4e2   :  { %v519_v20 = vmul.f32 %v2236_v12, %v510_v48  ;;  %v131_v48 = vld [vmem:[%s2598_s1 + $0x148] sm:$0xff] }
 0x4e4   :  { %v521_v22 = vsub.f32 %v504_v39, %v519_v20  ;;  %v130_v20 = vld [vmem:[%s2598_s1 + $0x140] sm:$0xff] }
 0x4e6   :  { %v523_v23 = vmul.f32 %v521_v22, %v521_v22 }
 0x4e8   :  { %v527_v28 = vsel %vm147_vm0, %v523_v23, 0.0 }
 0x4e9   :  { %528 = vadd.xlane.f32.xlu1 %v527_v28 }
 0x554   :  { %v526_v47 = vpop.xlane.xlu2 %525 }
 0x555   :  { %v530_v54 = vmul.f32 %v526_v47, %v2236_v12 }
 0x557   :  { %v532_v0 = vadd.f32 1e-05, %v530_v54 }
 0x559   :  { %1705 = vrsqrt.f32 %v532_v0  ;;  %vm540_vm12 = vweird.f32 %v532_v0 }
 0x55c   :  { %v529_v55 = vpop.xlane.xlu1 %528 }
 0x55d   :  { %v531_v56 = vmul.f32 %v529_v55, %v2236_v12 }
 0x55f   :  { %v1706_v29 = vpop.eup %1705  ;;  %v533_v30 = vadd.f32 1e-05, %v531_v56 }
 0x560   :  { %v535_v19 = vmul.f32 %v1706_v29, %v532_v0  ;;  %vm541_vm11 = vweird.f32 %v1706_v29 }
 0x561   :  { %1707 = vrsqrt.f32 %v533_v30  ;;  %vm542_vm13 = vmor %vm540_vm12, %vm541_vm11  ;;  %vm550_vm15 = vweird.f32 %v533_v30 }
 0x562   :  { %v536_v32 = vmul.f32 %v1706_v29, %v535_v19 }
 0x564   :  { %v537_v5 = vmul.f32 0.5, %v536_v32 }
 0x566   :  { %v538_v18 = vsub.f32 1.5, %v537_v5 }
 0x567   :  { %v1708_v33 = vpop.eup %1707 }
 0x568   :  { %v539_v37 = vmul.f32 %v1706_v29, %v538_v18  ;;  %v545_v34 = vmul.f32 %v1708_v33, %v533_v30  ;;  %vm551_vm14 = vweird.f32 %v1708_v33 }
 0x569   :  { %vm552_vm2 = vmor %vm550_vm15, %vm551_vm14 }
 0x56a   :  { %v543_v41 = vsel %vm542_vm13, %v1706_v29, %v539_v37  ;;  %v546_v57 = vmul.f32 %v1708_v33, %v545_v34 }
 0x56b   :  { %v554_v61 = vmul.f32 %v543_v41, %v520_v16  ;;  %v134_v16 = vld [vmem:[%s2598_s1 + $0x160] sm:$0xff] }
 0x56c   :  { %v547_v25 = vmul.f32 0.5, %v546_v57  ;;  %628 = vmatpush.msrb.mxu3 %v134_v16  ;;  %v1677_v57 = vld [vmem:[%s2599_s2 + $0x15] ss:$0 sm:$0xff] }
 0x56d   :  { %v557_v38 = vmul.f32 %v1674_v36, %v554_v61 }
 0x56e   :  { %v548_v39 = vsub.f32 1.5, %v547_v25  ;;  %629 = vmatpush.msrb.mxu3 %v133_v17 }
 0x56f   :  { %v560_v62 = vadd.f32 %v1675_v49, %v557_v38 }
 0x570   :  { %v549_v1 = vmul.f32 %v1708_v33, %v548_v39  ;;  %630 = vmatpush.msrb.mxu3 %v132_v58 }
 0x571   :  { %1557 = vmatmul.msk.f32.vlgmr.msrb.gmra.mxu1 %vm147_vm0, %v560_v62 }
 0x572   :  { %v553_v4 = vsel %vm552_vm2, %v1708_v33, %v549_v1  ;;  %631 = vmatpush.msrb.mxu3 %v131_v48 }
 0x573   :  { %v555_v6 = vmul.f32 %v553_v4, %v521_v22  ;;  %v1676_v22 = vld [vmem:[%s2599_s2 + $0x14] ss:$0 sm:$0xff] }
 0x574   :  { %632 = vmatpush.msrb.mxu3 %v130_v20 }
 0x575   :  { %v558_v7 = vmul.f32 %v1674_v36, %v555_v6 }
 0x577   :  { %v561_v8 = vadd.f32 %v1675_v49, %v558_v7 }
 0x579   :  { %1558 = vmatmul.msk.f32.gmra.mxu1 %vm147_vm0, %v561_v8 }
 0x5ee   :  { %v586_v23 = vpop.f32.mrf.mxu1 }
 0x5ef   :  { %v587_v28 = vadd.f32 %v1676_v22, %v586_v23  ;;  %v2325_v23 = vld [vmem:[%s2598_s1 + $0x188] sm:$0xff] }
 0x5f1   :  { %v592_v31 = vmul.f32 %v587_v28, %v587_v28 }
 0x5f3   :  { %v594_v43 = vmul.f32 %v592_v31, %v587_v28 }
 0x5f5   :  { %v596_v44 = vmul.f32 0.044715, %v594_v43 }
 0x5f6   :  { %v589_v45 = vpop.f32.mrf.mxu1 }
 0x5f7   :  { %v598_v47 = vadd.f32 %v596_v44, %v587_v28  ;;  %v590_v54 = vadd.f32 %v1676_v22, %v589_v45  ;;  %v2319_v22 = vld [vmem:[%s2598_s1 + $0x190] sm:$0xff] }
 0x5f9   :  { %v600_v0 = vmul.f32 0.7978846, %v598_v47  ;;  %v593_v55 = vmul.f32 %v590_v54, %v590_v54 }
 0x5fb   :  { %1709 = vtanh.f32 %v600_v0  ;;  %v595_v56 = vmul.f32 %v593_v55, %v590_v54 }
 0x5fd   :  { %v597_v29 = vmul.f32 0.044715, %v595_v56 }
 0x5ff   :  { %v599_v30 = vadd.f32 %v597_v29, %v590_v54 }
 0x601   :  { %v1710_v19 = vpop.eup %1709  ;;  %v601_v32 = vmul.f32 0.7978846, %v599_v30 }
 0x602   :  { %v604_v5 = vadd.f32 1.0, %v1710_v19 }
 0x603   :  { %1711 = vtanh.f32 %v601_v32 }
 0x604   :  { %v606_v18 = vmul.f32 0.5, %v604_v5 }
 0x606   :  { %v608_v33 = vmul.f32 %v606_v18, %v587_v28  ;;  %v2331_v28 = vld [vmem:[%s2598_s1 + $0x180] sm:$0xff] }
 0x607   :  { %v1657_v43 = vpack.i.bf16 %v2331_v28, %v2325_v23 }
 0x608   :  { %1559 = vmatmul.msk.f32.vlgmr.msrb.gmra.mxu3 %vm320_vm1, %v608_v33 }
 0x609   :  { %v1712_v37 = vpop.eup %1711 }
 0x60a   :  { %v605_v34 = vadd.f32 1.0, %v1712_v37  ;;  %v1678_v37 = vld [vmem:[%s2599_s2 + $0x16] ss:$0 sm:$0xff] }
 0x60c   :  { %v607_v36 = vmul.f32 0.5, %v605_v34 }
 0x60e   :  { %v609_v41 = vmul.f32 %v607_v36, %v590_v54 }
 0x610   :  { %1560 = vmatmul.msk.f32.gmra.mxu3 %vm320_vm1, %v609_v41 }
 0x68b   :  { %v634_v61 = vpop.f32.mrf.mxu3 }
 0x68c   :  { %v635_v49 = vadd.f32 %v1677_v57, %v634_v61 }
 0x68e   :  { %v640_v25 = vadd.f32 %v635_v49, %v560_v62 }
 0x690   :  { %v642_v38 = vsel %vm147_vm0, %v640_v25, 0.0 }
 0x691   :  { %643 = vadd.xlane.f32.xlu0 %v642_v38 }
 0x693   :  { %v637_v39 = vpop.f32.mrf.mxu3 }
 0x694   :  { %v638_v1 = vadd.f32 %v1677_v57, %v637_v39  ;;  %v1679_v57 = vld [vmem:[%s2599_s2 + $0x17] ss:$0 sm:$0xff] }
 0x696   :  { %v641_v4 = vadd.f32 %v638_v1, %v561_v8  ;;  %v2313_v8 = vld [vmem:[%s2598_s1 + $0x198] sm:$0xff] }
 0x697   :  { %735 = vmatpush.msrb.mxu2 %v2313_v8  ;;  %v1652_v31 = vpack.i.bf16 %v2319_v22, %v2313_v8 }
 0x698   :  { %v645_v6 = vsel %vm147_vm0, %v641_v4, 0.0 }
 0x699   :  { %646 = vadd.xlane.f32.xlu2 %v645_v6  ;;  %736 = vmatpush.msrb.mxu2 %v2319_v22 }
 0x69b   :  { %737 = vmatpush.msrb.mxu2 %v2325_v23 }
 0x69d   :  { %738 = vmatpush.msrb.mxu2 %v2331_v28 }
 0x704   :  { %v644_v7 = vpop.xlane.xlu0 %643 }
 0x705   :  { %v648_v11 = vmul.f32 %v644_v7, %v2236_v12 }
 0x707   :  { %v650_v53 = vsub.f32 %v640_v25, %v648_v11  ;;  %v1680_v11 = vld [vmem:[%s2599_s2 + $0x18] ss:$0 sm:$0xff] }
 0x709   :  { %v652_v13 = vmul.f32 %v650_v53, %v650_v53 }
 0x70b   :  { %v654_v16 = vsel %vm147_vm0, %v652_v13, 0.0 }
 0x70c   :  { %v647_v17 = vpop.xlane.xlu2 %646  ;;  %655 = vadd.xlane.f32.xlu1 %v654_v16 }
 0x70d   :  { %v649_v62 = vmul.f32 %v647_v17, %v2236_v12 }
 0x70f   :  { %v651_v58 = vsub.f32 %v641_v4, %v649_v62 }
 0x711   :  { %v653_v48 = vmul.f32 %v651_v58, %v651_v58 }
 0x713   :  { %v657_v20 = vsel %vm147_vm0, %v653_v48, 0.0 }
 0x714   :  { %658 = vadd.xlane.f32.xlu0 %v657_v20 }
 0x77f   :  { %v656_v44 = vpop.xlane.xlu1 %655 }
 0x780   :  { %v660_v45 = vmul.f32 %v656_v44, %v2236_v12 }
 0x782   :  { %v662_v47 = vadd.f32 1e-05, %v660_v45 }
 0x784   :  { %1713 = vrsqrt.f32 %v662_v47  ;;  %vm670_vm4 = vweird.f32 %v662_v47 }
 0x787   :  { %v659_v54 = vpop.xlane.xlu0 %658 }
 0x788   :  { %v661_v0 = vmul.f32 %v659_v54, %v2236_v12 }
 0x78a   :  { %v1714_v55 = vpop.eup %1713  ;;  %v663_v56 = vadd.f32 1e-05, %v661_v0 }
 0x78b   :  { %v665_v29 = vmul.f32 %v1714_v55, %v662_v47  ;;  %vm671_vm3 = vweird.f32 %v1714_v55 }
 0x78c   :  { %1715 = vrsqrt.f32 %v663_v56  ;;  %vm672_vm5 = vmor %vm670_vm4, %vm671_vm3  ;;  %vm680_vm7 = vweird.f32 %v663_v56 }
 0x78d   :  { %v666_v30 = vmul.f32 %v1714_v55, %v665_v29 }
 0x78f   :  { %v667_v19 = vmul.f32 0.5, %v666_v30 }
 0x791   :  { %v668_v32 = vsub.f32 1.5, %v667_v19 }
 0x792   :  { %v1716_v5 = vpop.eup %1715 }
 0x793   :  { %v669_v18 = vmul.f32 %v1714_v55, %v668_v32  ;;  %v675_v33 = vmul.f32 %v1716_v5, %v663_v56  ;;  %vm681_vm6 = vweird.f32 %v1716_v5 }
 0x794   :  { %vm682_vm8 = vmor %vm680_vm7, %vm681_vm6 }
 0x795   :  { %v673_v34 = vsel %vm672_vm5, %v1714_v55, %v669_v18  ;;  %v676_v36 = vmul.f32 %v1716_v5, %v675_v33 }
 0x796   :  { %v684_v41 = vmul.f32 %v673_v34, %v650_v53 }
 0x797   :  { %v677_v61 = vmul.f32 0.5, %v676_v36 }
 0x798   :  { %v687_v49 = vmul.f32 %v1678_v37, %v684_v41 }
 0x799   :  { %v678_v25 = vsub.f32 1.5, %v677_v61 }
 0x79a   :  { %v2346_v38 = vadd.f32 %v1679_v57, %v687_v49 }
 0x79b   :  { %v679_v39 = vmul.f32 %v1716_v5, %v678_v25 }
 0x79c   :  { %1561 = vmatmul.msk.f32.vlgmr.msrb.gmra.mxu2 %vm147_vm0, %v2346_v38 }
 0x79d   :  { %v683_v1 = vsel %vm682_vm8, %v1716_v5, %v679_v39 }
 0x79e   :  { %v685_v4 = vmul.f32 %v683_v1, %v651_v58 }
 0x7a0   :  { %v688_v6 = vmul.f32 %v1678_v37, %v685_v4 }
 0x7a2   :  { %v2350_v7 = vadd.f32 %v1679_v57, %v688_v6 }
 0x7a4   :  { %1562 = vmatmul.msk.f32.gmra.mxu2 %vm147_vm0, %v2350_v7 }
 0x81f   :  { %v740_v53 = vpop.f32.mrf.mxu2 }
 0x820   :  { %v741_v13 = vadd.f32 %v1680_v11, %v740_v53 }
 0x822   :  { %v752_v16 = vmul.f32 %v741_v13, %v2042_v63  ;;  %v748_v58 = vmul.f32 %v741_v13, %v2066_v10  ;;  %v750_v44 = vmul.f32 %v741_v13, %v2049_v2  ;;  %v760_v45 = vmul.f32 %v741_v13, %v2098_v26 }
 0x823   :  { %v754_v26 = vmul.f32 %v741_v13, %v2171_v51 }
 0x824   :  { %782 = vrot.lane.b32.xlu1 %v752_v16, %s1806_s20 }
 0x827   :  { %v743_v17 = vpop.f32.mrf.mxu2 }
 0x828   :  { %v744_v62 = vadd.f32 %v1680_v11, %v743_v17 }
 0x82a   :  { %v753_v48 = vmul.f32 %v744_v62, %v2035_v59  ;;  %v751_v20 = vmul.f32 %v744_v62, %v2037_v60  ;;  %v749_v63 = vmul.f32 %v744_v62, %v2051_v3  ;;  %v747_v10 = vmul.f32 %v744_v62, %v2077_v14 }
 0x82b   :  { %v746_v59 = vmul.f32 %v741_v13, %v2064_v9  ;;  %v761_v60 = vmul.f32 %v744_v62, %v2094_v24  ;;  %v759_v2 = vmul.f32 %v744_v62, %v2135_v35  ;;  %v758_v3 = vmul.f32 %v741_v13, %v2153_v42 }
 0x82c   :  { %774 = vrot.lane.b32.xlu1 %v748_v58, %s1806_s20  ;;  %784 = vrot.lane.b32.xlu2 %v753_v48, %s1806_s20  ;;  %v757_v9 = vmul.f32 %v744_v62, %v2169_v50  ;;  %v756_v14 = vmul.f32 %v741_v13, %v2189_v46  ;;  %v755_v24 = vmul.f32 %v744_v62, %v2206_v27 }
 0x82d   :  { %780 = vrot.lane.b32.xlu0 %v751_v20, %s1806_s20  ;;  %v1632_v47 = vpack.i.bf16 %v760_v45, %v761_v60  ;;  %v1637_v54 = vpack.i.bf16 %v758_v3, %v759_v2 }
 0x82e   :  { %v1642_v0 = vpack.i.bf16 %v756_v14, %v757_v9  ;;  %v1647_v55 = vpack.i.bf16 %v754_v26, %v755_v24 }
 0x834   :  { %778 = vrot.lane.b32.xlu2 %v750_v44, %s1806_s20 }
 0x835   :  { %776 = vrot.lane.b32.xlu0 %v749_v63, %s1806_s20 }
 0x83c   :  { %772 = vrot.lane.b32.xlu2 %v747_v10, %s1806_s20 }
 0x83d   :  { %770 = vrot.lane.b32.xlu0 %v746_v59, %s1806_s20 }
 0x845   :  { %1633 = vrot.lane.b32.xlu0 %v1632_v47, %s1807_s21 }
 0x84d   :  { %1638 = vrot.lane.b32.xlu0 %v1637_v54, %s1807_s21 }
 0x855   :  { %1643 = vrot.lane.b32.xlu0 %v1642_v0, %s1807_s21 }
 0x85d   :  { %1648 = vrot.lane.b32.xlu0 %v1647_v55, %s1807_s21 }
 0x865   :  { %1653 = vrot.lane.b32.xlu0 %v1652_v31, %s1805_s24 }
 0x886   :  { %v785_v35 = vpop.permute.xlu2 %784 }
 0x887   :  { %1563 = vmatpush.xpose.msk.msra.mxu0 %vm147_vm0, %v785_v35 }
 0x88e   :  { %v779_v46 = vpop.permute.xlu2 %778 }
 0x896   :  { %v783_v42 = vpop.permute.xlu1 %782  ;;  %v773_v8 = vpop.permute.xlu2 %772 }
 0x897   :  { %1564 = vmatpush.xpose.msk.msra.mxu0 %vm147_vm0, %v783_v42 }
 0x89e   :  { %v775_v27 = vpop.permute.xlu1 %774 }
 0x89f   :  { %v781_v50 = vpop.permute.xlu0 %780 }
 0x8a0   :  { %1565 = vmatpush.xpose.msk.msra.mxu0 %vm147_vm0, %v781_v50 }
 0x8a4   :  { %1566 = vmatpush.xpose.msk.msra.mxu0 %vm147_vm0, %v779_v46 }
 0x8a7   :  { %v777_v51 = vpop.permute.xlu0 %776 }
 0x8a8   :  { %1567 = vmatpush.xpose.msk.msra.mxu0 %vm147_vm0, %v777_v51 }
 0x8ac   :  { %1568 = vmatpush.xpose.msk.msra.mxu0 %vm147_vm0, %v775_v27 }
 0x8af   :  { %v771_v22 = vpop.permute.xlu0 %770 }
 0x8b0   :  { %1569 = vmatpush.xpose.msk.msra.mxu0 %vm147_vm0, %v773_v8 }
 0x8b4   :  { %1570 = vmatpush.xpose.msk.msra.mxu0 %vm147_vm0, %v771_v22 }
 0x8b7   :  { %v1634_v31 = vpop.permute.xlu0 %1633  ;;  %1571 = vmatmul.msk.f32.vlgmr.msra.gmra.mxu0 %vm147_vm0, %v741_v13 }
 0x8b8   :  { %v1635_v56 = vunpack.i.l.bf16 %v1634_v31  ;;  %v1636_v29 = vunpack.i.h.bf16 %v1634_v31 }
 0x8ba   :  { %952 = vmatpush.msra.mxu3 %v1635_v56  ;;  %v1681_v56 = vld [vmem:[%s2599_s2 + $0x19] ss:$0 sm:$0xff] }
 0x8bc   :  { %953 = vmatpush.msra.mxu3 %v1636_v29 }
 0x8bf   :  { %v1639_v30 = vpop.permute.xlu0 %1638  ;;  %1572 = vmatmul.msk.f32.gmra.mxu0 %vm147_vm0, %v744_v62 }
 0x8c0   :  { %v1640_v19 = vunpack.i.l.bf16 %v1639_v30  ;;  %v1641_v32 = vunpack.i.h.bf16 %v1639_v30 }
 0x8c2   :  { %954 = vmatpush.msra.mxu3 %v1640_v19 }
 0x8c4   :  { %955 = vmatpush.msra.mxu3 %v1641_v32 }
 0x8c7   :  { %v1644_v5 = vpop.permute.xlu0 %1643 }
 0x8c8   :  { %v1645_v18 = vunpack.i.l.bf16 %v1644_v5  ;;  %v1646_v33 = vunpack.i.h.bf16 %v1644_v5 }
 0x8ca   :  { %956 = vmatpush.msra.mxu3 %v1645_v18 }
 0x8cc   :  { %957 = vmatpush.msra.mxu3 %v1646_v33 }
 0x8cf   :  { %v1649_v37 = vpop.permute.xlu0 %1648 }
 0x8d0   :  { %v1650_v34 = vunpack.i.l.bf16 %v1649_v37  ;;  %v1651_v36 = vunpack.i.h.bf16 %v1649_v37 }
 0x8d2   :  { %958 = vmatpush.msra.mxu3 %v1650_v34 }
 0x8d4   :  { %959 = vmatpush.msra.mxu3 %v1651_v36 }
 0x8d7   :  { %v1654_v23 = vpop.permute.xlu0 %1653 }
 0x8d8   :  { %v1655_v48 = vunpack.i.l.bf16 %v1654_v23 }
 0x8da   :  { %1002 = vmatpush.msra.mxu2 %v1655_v48 }
 0x934   :  { %v825_v41 = vpop.f32.mrf.mxu0 }
 0x935   :  { %v831_v57 = vmul.f32 0.35355338, %v825_v41 }
 0x937   :  { %v833_v61 = vsel %vm320_vm1, %v831_v57, -inf }
 0x938   :  { %834 = vmax.xlane.f32.xlu1 %v833_v61 }
 0x93c   :  { %v828_v49 = vpop.f32.mrf.mxu0 }
 0x93d   :  { %v832_v25 = vmul.f32 0.35355338, %v828_v49 }
 0x93f   :  { %v836_v39 = vsel %vm320_vm1, %v832_v25, -inf }
 0x940   :  { %837 = vmax.xlane.f32.xlu2 %v836_v39 }
 0x951   :  { %1658 = vrot.lane.b32.xlu1 %v1657_v43, %s1805_s24  ;;  %v1656_v43 = vunpack.i.h.bf16 %v1654_v23 }
 0x953   :  { %1003 = vmatpush.msra.mxu2 %v1656_v43 }
 0x9ab   :  { %v835_v1 = vpop.xlane.xlu1 %834 }
 0x9ac   :  { %v839_v4 = vsub.f32 %v831_v57, %v835_v1 }
 0x9ae   :  { %v841_v6 = vmul.f32 1.442695, %v839_v4  ;;  %v698_v4 = vld [vmem:[%s2598_s1 + $0x1b0] sm:$0xff] }
 0x9b0   :  { %1717 = vpow2.f32 %v841_v6  ;;  %v697_v6 = vld [vmem:[%s2598_s1 + $0x1a8] sm:$0xff] }
 0x9b3   :  { %v838_v11 = vpop.xlane.xlu2 %837 }
 0x9b4   :  { %v840_v53 = vsub.f32 %v832_v25, %v838_v11  ;;  %v696_v11 = vld [vmem:[%s2598_s1 + $0x1a0] sm:$0xff] }
 0x9b6   :  { %v1718_v13 = vpop.eup %1717  ;;  %v843_v16 = vmul.f32 1.442695, %v840_v53 }
 0x9b7   :  { %v845_v17 = vmul.f32 %v1718_v13, %v2182_v15 }
 0x9b8   :  { %1719 = vpow2.f32 %v843_v16 }
 0x9b9   :  { %1573 = vmatmul.msk.f32.vlgmr.msra.gmra.mxu1 %vm320_vm1, %v845_v17 }
 0x9be   :  { %v1720_v62 = vpop.eup %1719 }
 0x9bf   :  { %v846_v58 = vmul.f32 %v1720_v62, %v2198_v21 }
 0x9c1   :  { %1574 = vmatmul.msk.f32.gmra.mxu1 %vm320_vm1, %v846_v58 }
 0x9c3   :  { %v1659_v28 = vpop.permute.xlu1 %1658 }
 0x9c4   :  { %v1660_v63 = vunpack.i.l.bf16 %v1659_v28  ;;  %v1661_v10 = vunpack.i.h.bf16 %v1659_v28 }
 0x9c6   :  { %1004 = vmatpush.msra.mxu2 %v1660_v63 }
 0x9c8   :  { %1005 = vmatpush.msra.mxu2 %v1661_v10 }
 0xa36   :  { %v870_v20 = vpop.f32.mrf.mxu1 }
 0xa37   :  { %v871_v44 = vadd.f32 %v870_v20, %v335_v52 }
 0xa39   :  { %1721 = vrcp.f32 %v871_v44  ;;  %v887_v3 = vand.u32 2147483648, %v871_v44  ;;  %v885_v15 = vand.u32 2147483647, %v871_v44  ;;  %vm881_vm10 = vweird.f32 %v871_v44 }
 0xa3b   :  { %v888_v14 = vor.u32 1.1754944e-38, %v887_v3  ;;  %vm886_vm12 = vcmp.eq.f32.partialorder %v885_v15, 8.507059e+37 }
 0xa3e   :  { %v873_v59 = vpop.f32.mrf.mxu1 }
 0xa3f   :  { %v1722_v60 = vpop.eup %1721  ;;  %v874_v45 = vadd.f32 %v873_v59, %v336_v40  ;;  %v1682_v59 = vld [vmem:[%s2599_s2 + $0x1a] ss:$0 sm:$0xff] }
 0xa40   :  { %v877_v47 = vmul.f32 %v1722_v60, %v871_v44  ;;  %vm882_vm9 = vweird.f32 %v1722_v60 }
 0xa41   :  { %1723 = vrcp.f32 %v874_v45  ;;  %vm883_vm11 = vmor %vm881_vm10, %vm882_vm9  ;;  %v902_v21 = vand.u32 2147483648, %v874_v45  ;;  %v900_v42 = vand.u32 2147483647, %v874_v45  ;;  %vm896_vm14 = vweird.f32 %v874_v45 }
 0xa42   :  { %v878_v2 = vsub.f32 1.0, %v877_v47 }
 0xa43   :  { %v903_v46 = vor.u32 1.1754944e-38, %v902_v21  ;;  %vm901_vm2 = vcmp.eq.f32.partialorder %v900_v42, 8.507059e+37  ;;  %v705_v21 = vld [vmem:[%s2598_s1 + $0x1e8] sm:$0xff]  ;;  %v703_v42 = vld [vmem:[%s2598_s1 + $0x1d8] sm:$0xff] }
 0xa44   :  { %v879_v54 = vmul.f32 %v1722_v60, %v878_v2  ;;  %v1683_v2 = vld [vmem:[%s2599_s2 + $0x1b] ss:$0 sm:$0xff] }
 0xa46   :  { %v880_v52 = vadd.f32 %v1722_v60, %v879_v54 }
 0xa47   :  { %v1724_v9 = vpop.eup %1723 }
 0xa48   :  { %v892_v0 = vmul.f32 %v1724_v9, %v874_v45  ;;  %v884_v24 = vsel %vm883_vm11, %v1722_v60, %v880_v52  ;;  %vm897_vm13 = vweird.f32 %v1724_v9 }
 0xa49   :  { %v889_v26 = vsel %vm886_vm12, %v888_v14, %v884_v24  ;;  %vm898_vm15 = vmor %vm896_vm14, %vm897_vm13 }
 0xa4a   :  { %v893_v55 = vsub.f32 1.0, %v892_v0  ;;  %v890_v35 = vmul.f32 %v889_v26, %v845_v17 }
 0xa4c   :  { %1575 = vmatmul.msk.f32.vlgmr.msra.gmra.mxu3 %vm320_vm1, %v890_v35  ;;  %v894_v40 = vmul.f32 %v1724_v9, %v893_v55  ;;  %v707_v55 = vld [vmem:[%s2598_s1 + $0x1f8] sm:$0xff]  ;;  %v706_v35 = vld [vmem:[%s2598_s1 + $0x1f0] sm:$0xff] }
 0xa4d   :  { %1128 = vmatpush.msrb.mxu3 %v707_v55 }
 0xa4e   :  { %v895_v50 = vadd.f32 %v1724_v9, %v894_v40  ;;  %v704_v40 = vld [vmem:[%s2598_s1 + $0x1e0] sm:$0xff] }
 0xa4f   :  { %1129 = vmatpush.msrb.mxu3 %v706_v35  ;;  %v1686_v35 = vld [vmem:[%s2599_s2 + $0x1e] ss:$0 sm:$0xff] }
 0xa50   :  { %v899_v51 = vsel %vm898_vm15, %v1724_v9, %v895_v50  ;;  %v702_v50 = vld [vmem:[%s2598_s1 + $0x1d0] sm:$0xff] }
 0xa51   :  { %v904_v27 = vsel %vm901_vm2, %v903_v46, %v899_v51  ;;  %1130 = vmatpush.msrb.mxu3 %v705_v21  ;;  %v701_v46 = vld [vmem:[%s2598_s1 + $0x1c8] sm:$0xff]  ;;  %v700_v51 = vld [vmem:[%s2598_s1 + $0x1c0] sm:$0xff] }
 0xa52   :  { %v905_v8 = vmul.f32 %v904_v27, %v846_v58  ;;  %v1684_v27 = vld [vmem:[%s2599_s2 + $0x1c] ss:$0 sm:$0xff] }
 0xa53   :  { %1131 = vmatpush.msrb.mxu3 %v704_v40 }
 0xa54   :  { %1576 = vmatmul.msk.f32.gmra.mxu3 %vm320_vm1, %v905_v8 }
 0xa55   :  { %1132 = vmatpush.msrb.mxu3 %v703_v42 }
 0xa57   :  { %1133 = vmatpush.msrb.mxu3 %v702_v50  ;;  %v1687_v50 = vld [vmem:[%s2599_s2 + $0x1f] ss:$0 sm:$0xff] }
 0xa59   :  { %1134 = vmatpush.msrb.mxu3 %v701_v46 }
 0xa5b   :  { %1135 = vmatpush.msrb.mxu3 %v700_v51 }
 0xacf   :  { %v961_v22 = vpop.f32.mrf.mxu3 }
 0xad0   :  { %1577 = vmatmul.msk.f32.vlgmr.msra.gmra.mxu2 %vm147_vm0, %v961_v22 }
 0xad7   :  { %v964_v31 = vpop.f32.mrf.mxu3 }
 0xad8   :  { %1578 = vmatmul.msk.f32.gmra.mxu2 %vm147_vm0, %v964_v31 }
 0xb53   :  { %v1007_v29 = vpop.f32.mrf.mxu2 }
 0xb54   :  { %v1008_v30 = vadd.f32 %v1681_v56, %v1007_v29 }
 0xb56   :  { %v1013_v19 = vadd.f32 %v1008_v30, %v2346_v38 }
 0xb58   :  { %v1015_v32 = vsel %vm147_vm0, %v1013_v19, 0.0 }
 0xb59   :  { %1016 = vadd.xlane.f32.xlu2 %v1015_v32 }
 0xb5b   :  { %v1010_v5 = vpop.f32.mrf.mxu2 }
 0xb5c   :  { %v1011_v18 = vadd.f32 %v1681_v56, %v1010_v5 }
 0xb5e   :  { %v1014_v33 = vadd.f32 %v1011_v18, %v2350_v7  ;;  %v699_v7 = vld [vmem:[%s2598_s1 + $0x1b8] sm:$0xff] }
 0xb5f   :  { %1084 = vmatpush.msrb.mxu1 %v699_v7  ;;  %v1685_v7 = vld [vmem:[%s2599_s2 + $0x1d] ss:$0 sm:$0xff] }
 0xb60   :  { %v1018_v37 = vsel %vm147_vm0, %v1014_v33, 0.0 }
 0xb61   :  { %1019 = vadd.xlane.f32.xlu0 %v1018_v37  ;;  %1085 = vmatpush.msrb.mxu1 %v698_v4 }
 0xb63   :  { %1086 = vmatpush.msrb.mxu1 %v697_v6 }
 0xb65   :  { %1087 = vmatpush.msrb.mxu1 %v696_v11 }
 0xbcc   :  { %v1017_v34 = vpop.xlane.xlu2 %1016 }
 0xbcd   :  { %v1021_v36 = vmul.f32 %v1017_v34, %v2236_v12 }
 0xbcf   :  { %v1023_v41 = vsub.f32 %v1013_v19, %v1021_v36 }
 0xbd1   :  { %v1025_v57 = vmul.f32 %v1023_v41, %v1023_v41 }
 0xbd3   :  { %v1027_v61 = vsel %vm147_vm0, %v1025_v57, 0.0 }
 0xbd4   :  { %v1020_v49 = vpop.xlane.xlu0 %1019  ;;  %1028 = vadd.xlane.f32.xlu2 %v1027_v61 }
 0xbd5   :  { %v1022_v38 = vmul.f32 %v1020_v49, %v2236_v12 }
 0xbd7   :  { %v1024_v25 = vsub.f32 %v1014_v33, %v1022_v38 }
 0xbd9   :  { %v1026_v39 = vmul.f32 %v1024_v25, %v1024_v25 }
 0xbdb   :  { %v1030_v1 = vsel %vm147_vm0, %v1026_v39, 0.0 }
 0xbdc   :  { %1031 = vadd.xlane.f32.xlu2 %v1030_v1 }
 0xc47   :  { %v1029_v53 = vpop.xlane.xlu2 %1028 }
 0xc48   :  { %v1033_v13 = vmul.f32 %v1029_v53, %v2236_v12 }
 0xc4a   :  { %v1035_v16 = vadd.f32 1e-05, %v1033_v13 }
 0xc4c   :  { %1725 = vrsqrt.f32 %v1035_v16  ;;  %vm1043_vm4 = vweird.f32 %v1035_v16 }
 0xc4f   :  { %v1032_v17 = vpop.xlane.xlu2 %1031 }
 0xc50   :  { %v1034_v62 = vmul.f32 %v1032_v17, %v2236_v12 }
 0xc52   :  { %v1726_v58 = vpop.eup %1725  ;;  %v1036_v23 = vadd.f32 1e-05, %v1034_v62 }
 0xc53   :  { %v1038_v28 = vmul.f32 %v1726_v58, %v1035_v16  ;;  %vm1044_vm3 = vweird.f32 %v1726_v58 }
 0xc54   :  { %1727 = vrsqrt.f32 %v1036_v23  ;;  %vm1045_vm5 = vmor %vm1043_vm4, %vm1044_vm3  ;;  %vm1053_vm7 = vweird.f32 %v1036_v23 }
 0xc55   :  { %v1039_v43 = vmul.f32 %v1726_v58, %v1038_v28 }
 0xc57   :  { %v1040_v48 = vmul.f32 0.5, %v1039_v43 }
 0xc59   :  { %v1041_v20 = vsub.f32 1.5, %v1040_v48 }
 0xc5a   :  { %v1728_v44 = vpop.eup %1727 }
 0xc5b   :  { %v1042_v63 = vmul.f32 %v1726_v58, %v1041_v20  ;;  %v1048_v10 = vmul.f32 %v1728_v44, %v1036_v23  ;;  %vm1054_vm6 = vweird.f32 %v1728_v44 }
 0xc5c   :  { %vm1055_vm8 = vmor %vm1053_vm7, %vm1054_vm6  ;;  %vm1247_vm6 = vcmask 130048   ;;  %vm1273_vm7 = vcmask 254976  }
 0xc5d   :  { %v1046_v60 = vsel %vm1045_vm5, %v1726_v58, %v1042_v63  ;;  %v1049_v45 = vmul.f32 %v1728_v44, %v1048_v10 }
 0xc5e   :  { %v1057_v47 = vmul.f32 %v1046_v60, %v1023_v41 }
 0xc5f   :  { %v1050_v3 = vmul.f32 0.5, %v1049_v45 }
 0xc60   :  { %v1060_v54 = vmul.f32 %v1682_v59, %v1057_v47 }
 0xc61   :  { %v1051_v15 = vsub.f32 1.5, %v1050_v3 }
 0xc62   :  { %v1063_v52 = vadd.f32 %v1683_v2, %v1060_v54 }
 0xc63   :  { %v1052_v9 = vmul.f32 %v1728_v44, %v1051_v15 }
 0xc64   :  { %1579 = vmatmul.msk.f32.vlgmr.msrb.gmra.mxu1 %vm147_vm0, %v1063_v52 }
 0xc65   :  { %v1056_v14 = vsel %vm1055_vm8, %v1728_v44, %v1052_v9 }
 0xc66   :  { %v1058_v0 = vmul.f32 %v1056_v14, %v1024_v25 }
 0xc68   :  { %v1061_v24 = vmul.f32 %v1682_v59, %v1058_v0 }
 0xc6a   :  { %v1064_v26 = vadd.f32 %v1683_v2, %v1061_v24 }
 0xc6c   :  { %1580 = vmatmul.msk.f32.gmra.mxu1 %vm147_vm0, %v1064_v26 }
 0xce1   :  { %v1089_v8 = vpop.f32.mrf.mxu1 }
 0xce2   :  { %v1090_v22 = vadd.f32 %v1684_v27, %v1089_v8 }
 0xce4   :  { %v1095_v31 = vmul.f32 %v1090_v22, %v1090_v22 }
 0xce6   :  { %v1097_v56 = vmul.f32 %v1095_v31, %v1090_v22 }
 0xce8   :  { %v1099_v29 = vmul.f32 0.044715, %v1097_v56 }
 0xce9   :  { %v1092_v30 = vpop.f32.mrf.mxu1 }
 0xcea   :  { %v1101_v19 = vadd.f32 %v1099_v29, %v1090_v22  ;;  %v1093_v32 = vadd.f32 %v1684_v27, %v1092_v30 }
 0xcec   :  { %v1103_v5 = vmul.f32 0.7978846, %v1101_v19  ;;  %v1096_v18 = vmul.f32 %v1093_v32, %v1093_v32 }
 0xcee   :  { %1729 = vtanh.f32 %v1103_v5  ;;  %v1098_v33 = vmul.f32 %v1096_v18, %v1093_v32 }
 0xcf0   :  { %v1100_v37 = vmul.f32 0.044715, %v1098_v33 }
 0xcf2   :  { %v1102_v34 = vadd.f32 %v1100_v37, %v1093_v32 }
 0xcf4   :  { %v1730_v36 = vpop.eup %1729  ;;  %v1104_v41 = vmul.f32 0.7978846, %v1102_v34 }
 0xcf5   :  { %v1107_v57 = vadd.f32 1.0, %v1730_v36 }
 0xcf6   :  { %1731 = vtanh.f32 %v1104_v41 }
 0xcf7   :  { %v1109_v61 = vmul.f32 0.5, %v1107_v57 }
 0xcf9   :  { %v1111_v49 = vmul.f32 %v1109_v61, %v1090_v22 }
 0xcfb   :  { %1581 = vmatmul.msk.f32.vlgmr.msrb.gmra.mxu3 %vm320_vm1, %v1111_v49 }
 0xcfc   :  { %v1732_v38 = vpop.eup %1731 }
 0xcfd   :  { %v1108_v25 = vadd.f32 1.0, %v1732_v38 }
 0xcff   :  { %v1110_v39 = vmul.f32 0.5, %v1108_v25 }
 0xd01   :  { %v1112_v1 = vmul.f32 %v1110_v39, %v1093_v32 }
 0xd03   :  { %1582 = vmatmul.msk.f32.gmra.mxu3 %vm320_vm1, %v1112_v1 }
 0xd7e   :  { %v1137_v4 = vpop.f32.mrf.mxu3 }
 0xd7f   :  { %v1138_v6 = vadd.f32 %v1685_v7, %v1137_v4 }
 0xd81   :  { %v1143_v11 = vadd.f32 %v1138_v6, %v1063_v52 }
 0xd83   :  { %v1145_v53 = vsel %vm147_vm0, %v1143_v11, 0.0 }
 0xd84   :  { %1146 = vadd.xlane.f32.xlu2 %v1145_v53 }
 0xd86   :  { %v1140_v13 = vpop.f32.mrf.mxu3 }
 0xd87   :  { %v1141_v16 = vadd.f32 %v1685_v7, %v1140_v13 }
 0xd89   :  { %v1144_v17 = vadd.f32 %v1141_v16, %v1064_v26 }
 0xd8b   :  { %v1148_v62 = vsel %vm147_vm0, %v1144_v17, 0.0 }
 0xd8c   :  { %1149 = vadd.xlane.f32.xlu1 %v1148_v62 }
 0xdf7   :  { %v1147_v58 = vpop.xlane.xlu2 %1146 }
 0xdf8   :  { %v1151_v43 = vmul.f32 %v1147_v58, %v2236_v12 }
 0xdfa   :  { %v1153_v44 = vsub.f32 %v1143_v11, %v1151_v43 }
 0xdfc   :  { %v1155_v10 = vmul.f32 %v1153_v44, %v1153_v44 }
 0xdfe   :  { %v1157_v59 = vsel %vm147_vm0, %v1155_v10, 0.0 }
 0xdff   :  { %v1150_v23 = vpop.xlane.xlu1 %1149 }
 0xe00   :  { %v1152_v28 = vmul.f32 %v1150_v23, %v2236_v12  ;;  %v1688_v23 = vld [vmem:[%s2599_s2 + $0x20] ss:$0 sm:$0xff] }
 0xe02   :  { %v1154_v48 = vsub.f32 %v1144_v17, %v1152_v28 }
 0xe04   :  { %v1156_v20 = vmul.f32 %v1154_v48, %v1154_v48 }
 0xe06   :  { %v1160_v63 = vsel %vm147_vm0, %v1156_v20, 0.0  ;;  %v1689_v20 = vld [vmem:[%s2599_s2 + $0x21] ss:$0 sm:$0xff] }
 0xe07   :  { %1161 = vadd.xlane.f32.xlu2 %v1160_v63 }
 0xe0f   :  { %1158 = vadd.xlane.f32.xlu2 %v1157_v59 }
 0xe7a   :  { %v1162_v60 = vpop.xlane.xlu2 %1161 }
 0xe7b   :  { %v1164_v45 = vmul.f32 %v1162_v60, %v2236_v12 }
 0xe7d   :  { %v1166_v47 = vadd.f32 1e-05, %v1164_v45 }
 0xe7f   :  { %1733 = vrsqrt.f32 %v1166_v47  ;;  %vm1183_vm9 = vweird.f32 %v1166_v47 }
 0xe82   :  { %v1159_v2 = vpop.xlane.xlu2 %1158 }
 0xe83   :  { %v1163_v3 = vmul.f32 %v1159_v2, %v2236_v12 }
 0xe85   :  { %v1734_v54 = vpop.eup %1733  ;;  %v1165_v15 = vadd.f32 1e-05, %v1163_v3 }
 0xe86   :  { %v1178_v52 = vmul.f32 %v1734_v54, %v1166_v47  ;;  %vm1184_vm1 = vweird.f32 %v1734_v54 }
 0xe87   :  { %1735 = vrsqrt.f32 %v1165_v15  ;;  %vm1185_vm10 = vmor %vm1183_vm9, %vm1184_vm1  ;;  %vm1173_vm12 = vweird.f32 %v1165_v15 }
 0xe88   :  { %v1179_v9 = vmul.f32 %v1734_v54, %v1178_v52 }
 0xe8a   :  { %v1180_v14 = vmul.f32 0.5, %v1179_v9 }
 0xe8c   :  { %v1181_v0 = vsub.f32 1.5, %v1180_v14 }
 0xe8d   :  { %v1736_v24 = vpop.eup %1735 }
 0xe8e   :  { %v1182_v26 = vmul.f32 %v1734_v54, %v1181_v0  ;;  %v1168_v55 = vmul.f32 %v1736_v24, %v1165_v15  ;;  %vm1174_vm11 = vweird.f32 %v1736_v24 }
 0xe8f   :  { %vm1175_vm13 = vmor %vm1173_vm12, %vm1174_vm11 }
 0xe90   :  { %v1169_v21 = vmul.f32 %v1736_v24, %v1168_v55  ;;  %v1186_v40 = vsel %vm1185_vm10, %v1734_v54, %v1182_v26  ;;  %v37_v54 = vld [vmem:[%s2599_s2 + $0xb8] sm:$0x3]  ;;  %vm1495_vm10 = vcmask 91136  }
 0xe91   :  { %v1188_v42 = vmul.f32 %v1186_v40, %v1154_v48  ;;  %v1303_v55 = vld [vmem:[%s2598_s1 + $0x218] sm:$0xff]  ;;  %v1301_v40 = vld [vmem:[%s2598_s1 + $0x208] sm:$0xff] }
 0xe92   :  { %v1170_v46 = vmul.f32 0.5, %v1169_v21  ;;  %1321 = vmatpush.msrb.mxu0 %v1303_v55 }
 0xe93   :  { %v1191_v51 = vmul.f32 %v1686_v35, %v1188_v42  ;;  %v1300_v42 = vld [vmem:[%s2598_s1 + $0x200] sm:$0xff] }
 0xe94   :  { %v1171_v27 = vsub.f32 1.5, %v1170_v46 }
 0xe95   :  { %v1194_v8 = vadd.f32 %v1687_v50, %v1191_v51 }
 0xe96   :  { %v1172_v22 = vmul.f32 %v1736_v24, %v1171_v27 }
 0xe97   :  { %v1200_v31 = vsel %vm147_vm0, %v1194_v8, 0.0 }
 0xe98   :  { %1201 = vadd.xlane.f32.xlu0 %v1200_v31  ;;  %v1176_v56 = vsel %vm1175_vm13, %v1736_v24, %v1172_v22 }
 0xe99   :  { %v1187_v29 = vmul.f32 %v1176_v56, %v1153_v44 }
 0xe9b   :  { %v1190_v30 = vmul.f32 %v1686_v35, %v1187_v29  ;;  %v1302_v35 = vld [vmem:[%s2598_s1 + $0x210] sm:$0xff] }
 0xe9c   :  { %1322 = vmatpush.msrb.mxu0 %v1302_v35  ;;  %v1662_v21 = vpack.i.bf16 %v1302_v35, %v1303_v55 }
 0xe9d   :  { %v1193_v19 = vadd.f32 %v1687_v50, %v1190_v30  ;;  %v1667_v50 = vpack.i.bf16 %v1300_v42, %v1301_v40 }
 0xe9e   :  { %1323 = vmatpush.msrb.mxu0 %v1301_v40 }
 0xe9f   :  { %v1197_v32 = vsel %vm147_vm0, %v1193_v19, 0.0 }
 0xea0   :  { %1198 = vadd.xlane.f32.xlu2 %v1197_v32  ;;  %1324 = vmatpush.msrb.mxu0 %v1300_v42 }
 0xf0b   :  { %v1202_v5 = vpop.xlane.xlu0 %1201 }
 0xf0c   :  { %v1204_v18 = vmul.f32 %v1202_v5, %v2236_v12 }
 0xf0e   :  { %v1206_v33 = vsub.f32 %v1194_v8, %v1204_v18 }
 0xf10   :  { %v1208_v37 = vmul.f32 %v1206_v33, %v1206_v33 }
 0xf12   :  { %v1212_v34 = vsel %vm147_vm0, %v1208_v37, 0.0 }
 0xf13   :  { %1213 = vadd.xlane.f32.xlu0 %v1212_v34  ;;  %v1199_v36 = vpop.xlane.xlu2 %1198 }
 0xf14   :  { %v1203_v41 = vmul.f32 %v1199_v36, %v2236_v12 }
 0xf16   :  { %v1205_v57 = vsub.f32 %v1193_v19, %v1203_v41  ;;  %v1690_v19 = vld [vmem:[%s2599_s2 + $0x22] ss:$0 sm:$0xff] }
 0xf18   :  { %v1207_v61 = vmul.f32 %v1205_v57, %v1205_v57 }
 0xf1a   :  { %v1209_v49 = vsel %vm147_vm0, %v1207_v61, 0.0 }
 0xf1b   :  { %1210 = vadd.xlane.f32.xlu2 %v1209_v49  ;;  %v1382_v49 = vld [vmem:[%s2598_s1 + $0x278] sm:$0xff] }
 0xf1c   :  { %1393 = vmatpush.msra.mxu3 %v1382_v49 }
 0xf33   :  { %1663 = vrot.lane.b32.xlu2 %v1662_v21, %s1806_s20 }
 0xf86   :  { %v1214_v38 = vpop.xlane.xlu0 %1213 }
 0xf87   :  { %v1216_v25 = vmul.f32 %v1214_v38, %v2236_v12  ;;  %v1381_v38 = vld [vmem:[%s2598_s1 + $0x270] sm:$0xff] }
 0xf88   :  { %1394 = vmatpush.msra.mxu3 %v1381_v38 }
 0xf89   :  { %v1218_v39 = vadd.f32 1e-05, %v1216_v25  ;;  %v1380_v25 = vld [vmem:[%s2598_s1 + $0x268] sm:$0xff] }
 0xf8a   :  { %1395 = vmatpush.msra.mxu3 %v1380_v25 }
 0xf8b   :  { %1737 = vrsqrt.f32 %v1218_v39  ;;  %vm1235_vm15 = vweird.f32 %v1218_v39 }
 0xf8e   :  { %v1211_v1 = vpop.xlane.xlu2 %1210 }
 0xf8f   :  { %v1215_v7 = vmul.f32 %v1211_v1, %v2236_v12  ;;  %v1378_v1 = vld [vmem:[%s2598_s1 + $0x258] sm:$0xff] }
 0xf91   :  { %v1738_v4 = vpop.eup %1737  ;;  %v1217_v6 = vadd.f32 1e-05, %v1215_v7  ;;  %v1377_v7 = vld [vmem:[%s2598_s1 + $0x250] sm:$0xff] }
 0xf92   :  { %v1230_v11 = vmul.f32 %v1738_v4, %v1218_v39  ;;  %vm1236_vm14 = vweird.f32 %v1738_v4  ;;  %v1379_v39 = vld [vmem:[%s2598_s1 + $0x260] sm:$0xff] }
 0xf93   :  { %1739 = vrsqrt.f32 %v1217_v6  ;;  %vm1237_vm2 = vmor %vm1235_vm15, %vm1236_vm14  ;;  %vm1225_vm4 = vweird.f32 %v1217_v6  ;;  %1396 = vmatpush.msra.mxu3 %v1379_v39 }
 0xf94   :  { %v1231_v53 = vmul.f32 %v1738_v4, %v1230_v11  ;;  %v1374_v11 = vld [vmem:[%s2598_s1 + $0x238] sm:$0xff] }
 0xf95   :  { %1397 = vmatpush.msra.mxu3 %v1378_v1 }
 0xf96   :  { %v1232_v13 = vmul.f32 0.5, %v1231_v53  ;;  %v1664_v37 = vpop.permute.xlu2 %1663  ;;  %v1692_v53 = vld [vmem:[%s2599_s2 + $0x24] ss:$0 sm:$0xff] }
 0xf97   :  { %v1666_v34 = vunpack.i.h.bf16 %v1664_v37  ;;  %v1665_v36 = vunpack.i.l.bf16 %v1664_v37  ;;  %1398 = vmatpush.msra.mxu3 %v1377_v7 }
 0xf98   :  { %v1233_v16 = vsub.f32 1.5, %v1232_v13 }
 0xf99   :  { %v1740_v17 = vpop.eup %1739  ;;  %1362 = vmatpush.msra.mxu1 %v1665_v36 }
 0xf9a   :  { %v1234_v62 = vmul.f32 %v1738_v4, %v1233_v16  ;;  %v1220_v58 = vmul.f32 %v1740_v17, %v1217_v6  ;;  %vm1226_vm3 = vweird.f32 %v1740_v17  ;;  %v1375_v6 = vld [vmem:[%s2598_s1 + $0x240] sm:$0xff] }
 0xf9b   :  { %vm1227_vm5 = vmor %vm1225_vm4, %vm1226_vm3  ;;  %1363 = vmatpush.msra.mxu1 %v1666_v34 }
 0xf9c   :  { %v1238_v28 = vsel %vm1237_vm2, %v1738_v4, %v1234_v62  ;;  %v1221_v43 = vmul.f32 %v1740_v17, %v1220_v58  ;;  %v1376_v4 = vld [vmem:[%s2598_s1 + $0x248] sm:$0xff]  ;;  %v1371_v58 = vld [vmem:[%s2598_s1 + $0x220] sm:$0xff] }
 0xf9d   :  { %v1240_v48 = vmul.f32 %v1238_v28, %v1206_v33  ;;  %1399 = vmatpush.msra.mxu3 %v1376_v4  ;;  %v1372_v62 = vld [vmem:[%s2598_s1 + $0x228] sm:$0xff] }
 0xf9e   :  { %v1222_v44 = vmul.f32 0.5, %v1221_v43 }
 0xf9f   :  { %v1243_v63 = vmul.f32 %v1688_v23, %v1240_v48  ;;  %1400 = vmatpush.msra.mxu3 %v1375_v6 }
 0xfa0   :  { %v1223_v10 = vsub.f32 1.5, %v1222_v44 }
 0xfa1   :  { %v1246_v59 = vadd.f32 %v1689_v20, %v1243_v63  ;;  %1401 = vmatpush.msra.mxu3 %v1374_v11 }
 0xfa2   :  { %v1224_v60 = vmul.f32 %v1740_v17, %v1223_v10 }
 0xfa3   :  { %1265 = vmatpush.msrb.mxu2 %v1246_v59 }
 0xfa4   :  { %v1228_v45 = vsel %vm1227_vm5, %v1740_v17, %v1224_v60  ;;  %v1373_v17 = vld [vmem:[%s2598_s1 + $0x230] sm:$0xff] }
 0xfa5   :  { %v1239_v47 = vmul.f32 %v1228_v45, %v1205_v57  ;;  %1402 = vmatpush.msra.mxu3 %v1373_v17 }
 0xfa7   :  { %v1242_v2 = vmul.f32 %v1688_v23, %v1239_v47  ;;  %1403 = vmatpush.msra.mxu3 %v1372_v62  ;;  %v1693_v23 = vld [vmem:[%s2599_s2 + $0x25] ss:$0 sm:$0xff] }
 0xfa9   :  { %v1245_v3 = vadd.f32 %v1689_v20, %v1242_v2  ;;  %1404 = vmatpush.msra.mxu3 %v1371_v58  ;;  %v1694_v20 = vld [vmem:[%s2599_s2 + $0x26] ss:$0 sm:$0xff] }
 0xfab   :  { %1266 = vmatpush.msrb.mxu2 %v1245_v3 }
 0xfac   :  { %1583 = vmatmul.msk.f32.vlgmr.msrb.gmra.mxu2 %vm1247_vm6, %v37_v54 }
0x102f   :  { %v1268_v15 = vpop.f32.mrf.mxu2 }
0x1030   :  { %v1274_v52 = vsel %vm1273_vm7, %v1268_v15, 0.0 }
0x1031   :  { %1275 = vadd.xlane.f32.xlu0 %v1274_v52 }
0x1045   :  { %1668 = vrot.lane.b32.xlu0 %v1667_v50, %s1806_s20 }
0x10a4   :  { %v1276_v9 = vpop.xlane.xlu0 %1275 }
0x10a5   :  { %v1277_v14 = vmul.f32 %v1276_v9, %v2236_v12 }
0x10a7   :  { %v1278_v0 = vsub.f32 %v1268_v15, %v1277_v14 }
0x10a9   :  { %v1279_v24 = vmul.f32 %v1278_v0, %v1278_v0 }
0x10ab   :  { %v1280_v26 = vsel %vm1273_vm7, %v1279_v24, 0.0  ;;  %v1814_v24 = vmov 2.0   ;;  %vm1501_vm7 = vcmask 25600  }
0x10ac   :  { %1281 = vadd.xlane.f32.xlu1 %v1280_v26 }
0x10b7   :  { %v1669_v41 = vpop.permute.xlu0 %1668 }
0x10b8   :  { %v1671_v57 = vunpack.i.h.bf16 %v1669_v41  ;;  %v1670_v61 = vunpack.i.l.bf16 %v1669_v41 }
0x10ba   :  { %1364 = vmatpush.msra.mxu1 %v1670_v61 }
0x10bc   :  { %1365 = vmatpush.msra.mxu1 %v1671_v57 }
0x111f   :  { %v1282_v46 = vpop.xlane.xlu1 %1281 }
0x1120   :  { %v1283_v51 = vmul.f32 %v1282_v46, %v2236_v12  ;;  %v1691_v12 = vld [vmem:[%s2599_s2 + $0x23] ss:$0 sm:$0xff]  ;;  %s1813_s2 = smov 108  }
0x1122   :  { %v1284_v27 = vadd.f32 1e-05, %v1283_v51 }
0x1124   :  { %1741 = vrsqrt.f32 %v1284_v27  ;;  %vm1291_vm1 = vweird.f32 %v1284_v27 }
0x112a   :  { %v1742_v8 = vpop.eup %1741 }
0x112b   :  { %v1286_v22 = vmul.f32 %v1742_v8, %v1284_v27  ;;  %vm1292_vm8 = vweird.f32 %v1742_v8 }
0x112c   :  { %vm1293_vm9 = vmor %vm1291_vm1, %vm1292_vm8  ;;  %vm1484_vm8 = vcmask 31744   ;;  %vm1486_vm1 = vcmask 64512  }
0x112d   :  { %v1287_v31 = vmul.f32 %v1742_v8, %v1286_v22 }
0x112f   :  { %v1288_v56 = vmul.f32 0.5, %v1287_v31 }
0x1131   :  { %v1289_v29 = vsub.f32 1.5, %v1288_v56 }
0x1133   :  { %v1290_v30 = vmul.f32 %v1742_v8, %v1289_v29 }
0x1135   :  { %v1294_v32 = vsel %vm1293_vm9, %v1742_v8, %v1290_v30  ;;  %vm1488_vm9 = vcmask 97280  }
0x1136   :  { %v1295_v5 = vmul.f32 %v1294_v32, %v1278_v0 }
0x1138   :  { %v1297_v18 = vmul.f32 %v1690_v19, %v1295_v5 }
0x113a   :  { %v1299_v33 = vadd.f32 %v1691_v12, %v1297_v18 }
0x113c   :  { %1584 = vmatmul.msk.f32.vlgmr.msrb.gmra.mxu0 %vm147_vm0, %v1299_v33 }
0x11b9   :  { %v1326_v13 = vpop.f32.mrf.mxu0 }
0x11ba   :  { %v1327_v16 = vadd.f32 %v1692_v53, %v1326_v13 }
0x11bc   :  { %1585 = vmatmul.msk.f32.vlgmr.msra.gmra.mxu1 %vm147_vm0, %v1327_v16  ;;  %vm1385_vm0 = vcmask 785408  }
0x1239   :  { %v1367_v28 = vpop.f32.mrf.mxu1 }
0x123a   :  { %v1368_v43 = vadd.f32 %v1693_v23, %v1367_v28 }
0x123c   :  { %v1370_v48 = vmax.f32 %v1368_v43, 0.0 }
0x123e   :  { %1586 = vmatmul.msk.f32.vlgmr.msra.gmra.mxu3 %vm1385_vm0, %v1370_v48  ;;  %vm1493_vm0 = vcmask 156672  }
0x12c1   :  { %v1406_v44 = vpop.f32.mrf.mxu3 }
0x12c2   :  { %v1407_v63 = vadd.f32 %v1694_v20, %v1406_v44 }
0x12c4   :  { %1415 = vrot.lane.b32.xlu2 %v1407_v63, %s1809_s28  ;;  %1411 = vrot.lane.b32.xlu1 %v1407_v63, %s1810_s29 }
0x131e   :  { %v1416_v60 = vpop.permute.xlu2 %1415 }
0x1336   :  { %v1412_v10 = vpop.permute.xlu1 %1411 }
0x1337   :  { %v1414_v59 = vmax.f32 %v1407_v63, %v1412_v10  ;;  %1496 = vst.msk [vmem:[%s2601_s4] sm:$0x3] %vm1495_vm10, %v1412_v10  ;;  %s1815_s4 = smov 88  }
0x1339   :  { %v1418_v45 = vmax.f32 %v1414_v59, %v1416_v60 }
0x133b   :  { %1423 = vrot.lane.b32.xlu2 %v1418_v45, %s1811_s6  ;;  %1429 = vrot.lane.b32.xlu0 %v1418_v45, %s1812_s7  ;;  %v1419_v35 = vsub.f32 %v1407_v63, %v1418_v45 }
0x133d   :  { %v1420_v21 = vmul.f32 1.442695, %v1419_v35 }
0x1395   :  { %v1424_v47 = vpop.permute.xlu2 %1423 }
0x1396   :  { %v1426_v2 = vsub.f32 %v1407_v63, %v1424_v47 }
0x1398   :  { %v1427_v3 = vmul.f32 1.442695, %v1426_v2 }
0x139a   :  { %1743 = vpow2.f32 %v1427_v3 }
0x13a0   :  { %v1744_v54 = vpop.eup %1743 }
0x13a1   :  { %1436 = vrot.lane.b32.xlu1 %v1744_v54, %s1810_s29 }
0x13ad   :  { %v1430_v15 = vpop.permute.xlu0 %1429 }
0x13ae   :  { %v1432_v52 = vsub.f32 %v1407_v63, %v1430_v15 }
0x13b0   :  { %v1433_v9 = vmul.f32 1.442695, %v1432_v52 }
0x13b2   :  { %1745 = vpow2.f32 %v1433_v9 }
0x13b3   :  { %1747 = vtanh.f32 %v1407_v63 }
0x13b4   :  { %1749 = vpow2.f32 %v1420_v21 }
0x13b8   :  { %v1746_v14 = vpop.eup %1745 }
0x13b9   :  { %1441 = vrot.lane.b32.xlu2 %v1746_v14, %s1809_s28  ;;  %1465 = vrot.lane.b32.xlu0 %v1746_v14, %s1810_s29  ;;  %v1748_v55 = vpop.eup %1747 }
0x13ba   :  { %v1750_v42 = vpop.eup %1749 }
0x13c1   :  { %1481 = vrot.lane.b32.xlu2 %v1407_v63, %s1813_s2 }
0x1413   :  { %v1437_v40 = vpop.permute.xlu1 %1436  ;;  %v1442_v46 = vpop.permute.xlu2 %1441 }
0x1414   :  { %v1439_v50 = vadd.f32 %v1750_v42, %v1437_v40  ;;  %v1445_v19 = vmax.f32 %v1750_v42, %v1437_v40  ;;  %vm1462_vm2 = vcmp.ge.f32.partialorder %v1750_v42, %v1437_v40  ;;  %vm1463_vm3 = vcmp.ge.f32.partialorder %v1750_v42, %v1442_v46 }
0x1415   :  { %vm1464_vm4 = vmand %vm1462_vm2, %vm1463_vm3 }
0x1416   :  { %v1444_v51 = vadd.f32 %v1442_v46, %v1439_v50  ;;  %v1446_v18 = vmax.f32 %v1445_v19, %v1442_v46 }
0x1418   :  { %1751 = vrcp.f32 %v1444_v51  ;;  %v1458_v29 = vand.u32 2147483648, %v1444_v51  ;;  %vm1452_vm13 = vweird.f32 %v1444_v51  ;;  %v1456_v30 = vand.u32 2147483647, %v1444_v51 }
0x141a   :  { %v1459_v5 = vor.u32 1.1754944e-38, %v1458_v29  ;;  %vm1457_vm15 = vcmp.eq.f32.partialorder %v1456_v30, 8.507059e+37 }
0x141b   :  { %v1482_v61 = vpop.permute.xlu2 %1481 }
0x141e   :  { %v1752_v27 = vpop.eup %1751 }
0x141f   :  { %v1448_v8 = vmul.f32 %v1752_v27, %v1444_v51  ;;  %vm1453_vm12 = vweird.f32 %v1752_v27 }
0x1420   :  { %vm1454_vm14 = vmor %vm1452_vm13, %vm1453_vm12 }
0x1421   :  { %v1449_v22 = vsub.f32 1.0, %v1448_v8 }
0x1423   :  { %v1450_v31 = vmul.f32 %v1752_v27, %v1449_v22 }
0x1425   :  { %v1451_v56 = vadd.f32 %v1752_v27, %v1450_v31 }
0x1427   :  { %v1455_v32 = vsel %vm1454_vm14, %v1752_v27, %v1451_v56 }
0x1428   :  { %v1460_v12 = vsel %vm1457_vm15, %v1459_v5, %v1455_v32 }
0x1429   :  { %v1461_v33 = vmul.f32 %v1460_v12, %v1446_v18 }
0x142b   :  { %v1466_v0 = vpop.permute.xlu0 %1465  ;;  %vm1475_vm5 = vcmp.lt.f32.partialorder %v1461_v33, 0.45 }
0x142c   :  { %vm1468_vm11 = vcmp.ge.f32.partialorder %v1744_v54, %v1466_v0 }
0x142d   :  { %v1469_v26 = vsel %vm1468_vm11, 1.0, %v1814_v24 }
0x142e   :  { %1471 = vrot.lane.b32.xlu0 %v1469_v26, %s1810_s29 }
0x1436   :  { %1498 = vrot.lane.b32.xlu0 %v1748_v55, %s1815_s4 }
0x14a0   :  { %v1472_v37 = vpop.permute.xlu0 %1471 }
0x14a1   :  { %v1474_v34 = vsel %vm1464_vm4, 0.0, %v1472_v37 }
0x14a2   :  { %v1476_v36 = vsel %vm1475_vm5, 2.0, %v1474_v34 }
0x14a3   :  { %1478 = vrot.lane.b32.xlu1 %v1476_v36, %s1816_s8 }
0x14a8   :  { %v1499_v41 = vpop.permute.xlu0 %1498 }
0x14a9   :  { %1502 = vst.msk [vmem:[#allocation4] sm:$0x3] %vm1501_vm7, %v1499_v41 }
0x14aa   :  { %1526 = dma.vmem_to_hbm [thread:$0]  %s1522_s10, 32, %s1524_s13, [#allocation5]  }
0x1515   :  { %v1479_v57 = vpop.permute.xlu1 %1478 }
0x1516   :  { %v1485_v49 = vsel %vm1484_vm8, %v1748_v55, %v1479_v57 }
0x1517   :  { %v1487_v38 = vsel %vm1486_vm1, %v1485_v49, %v1482_v61 }
0x1518   :  { %v1489_v25 = vsel %vm1488_vm9, %v1487_v38, %v1482_v61 }
0x1519   :  { %v1490_v39 = vsel %vm1247_vm6, %v1489_v25, %v1482_v61 }
0x151a   :  { %v1587_v1 = vclamps-f32 %v1490_v39, 10.0 }
0x151c   :  { %1494 = vst.msk [vmem:[#allocation2] sm:$0x3] %vm1493_vm0, %v1587_v1 }
0x151d   :  { %1513 = dma.vmem_to_hbm [thread:$0]  %s1509_s15, 32, %s1511_s18, [#allocation3]  }
0x151e   :  { %1801 = dma.done.wait [#allocation3], 32  }
0x151f   :  { %1802 = vsyncadd [#allocation3], 4294967264 }
0x1520   :  { %1803 = dma.done.wait [#allocation5], 32  }
0x1521   :  { %1804 = vsyncadd [#allocation5], 4294967264 }
0x1522   :  { %1537 = vsyncpa [#allocation3], 1 }
0x1523   :  { %1538 = vsyncpa [#allocation5], 1 }

</bundles_post_ra>
